<compile_context>
chip_gen: v7x
topology: tpu7x:2x2x1
jax: 0.10.0
libtpu: 0.0.40
codegen_flags: <defaults>
</compile_context>

<pallas_src>
import functools

import jax
import jax.numpy as jnp
from jax.experimental import pallas as pl
from jax.experimental.pallas import tpu as pltpu

EPS = 1e-5


# ---------------------------------------------------------------------------
# Fused kernel: one image per grid step.
#   x_ref   : (1, H, W, C)      bf16   input image (also the residual)
#   w1_ref  : (3, 3*C, C)       bf16   conv1 weights, taps packed into K
#   w2_ref  : (3, 3*C, C)       bf16   conv2 weights, taps packed into K
#   aff_ref : (8, C)            f32    merged per-channel affine params
#   o_ref   : (1, H*W, C)       f32    output slab
#   col_ref : (H+2, W, 3*C)     bf16   packed 3-tap patches (+ zero halo)
# ---------------------------------------------------------------------------
def _fused_block_kernel(x_ref, w1_ref, w2_ref, aff_ref, o_ref,
                        col_ref, *, H, W, C, half):
    HW = H * W

    # Zero once: the never-written border rows/columns of col_ref are the
    # SAME-padding halo for BOTH convolutions (the two fills below write
    # exactly the same interior slices).
    col_ref[...] = jnp.zeros_like(col_ref)

    def fill_col(img):  # img: (H, W, C) bf16 -> pack the 3 dw taps into lanes
        col_ref[1:H + 1, 1:W, 0:C] = img[:, 0:W - 1, :]           # dw = 0
        col_ref[1:H + 1, :, C:2 * C] = img                        # dw = 1
        col_ref[1:H + 1, 0:W - 1, 2 * C:3 * C] = img[:, 1:W, :]   # dw = 2

    def conv(w_ref):  # 3 MXU matmuls with K = 3*C (taps packed into K)
        colf = col_ref[...].reshape((H + 2) * W, 3 * C)
        acc = jnp.dot(colf[0:HW, :], w_ref[0],
                      preferred_element_type=jnp.float32)
        for dh in range(1, 3):  # static; sublane slice offsets dh*W are aligned
            acc = acc + jnp.dot(colf[dh * W:dh * W + HW, :], w_ref[dh],
                                preferred_element_type=jnp.float32)
        return acc  # (HW, C) f32 value — no scratch round trip

    aff = aff_ref[...]  # (8, C) f32

    # ---- conv1 ----
    x_img = x_ref[0]
    fill_col(x_img)
    a1 = conv(w1_ref)

    # ---- IBN_a + ReLU ----
    # InstanceNorm (first `half` channels): per-sample spatial stats, biased
    # variance, single pass (sum + sum of squares). Eval BN (second half) is
    # pre-folded into scale/shift rows of `aff`. All per-channel selection and
    # folding happens on (1, C) rows; the (HW, C) activation only sees
    # a1 * scale + shift followed by ReLU.
    inv_hw = 1.0 / HW
    s1 = jnp.sum(a1, axis=0, keepdims=True)
    s2 = jnp.sum(a1 * a1, axis=0, keepdims=True)
    mu = s1 * inv_hw
    var = s2 * inv_hw - mu * mu
    s_in = jax.lax.rsqrt(var + EPS) * aff[0:1]      # IN scale  (1, C)
    b_in = aff[1:2] - mu * s_in                     # IN shift  (1, C)
    ch = jax.lax.broadcasted_iota(jnp.int32, (1, C), 1)
    is_in = ch < half
    scale1 = jnp.where(is_in, s_in, aff[2:3])       # BN1 scale on second half
    shift1 = jnp.where(is_in, b_in, aff[3:4])       # BN1 shift on second half
    y = jnp.maximum(a1 * scale1 + shift1, 0.0)

    # ---- conv2 (reuses col_ref; intermediate never leaves VMEM) ----
    fill_col(y.astype(col_ref.dtype).reshape(H, W, C))
    a2 = conv(w2_ref)

    # ---- BN2 (eval, folded) + residual + ReLU ----
    res = x_img.reshape(HW, C).astype(jnp.float32)
    z = a2 * aff[4:5] + aff[5:6] + res
    o_ref[0] = jnp.maximum(z, 0.0).astype(o_ref.dtype)


# ---------------------------------------------------------------------------
# Wrapper: NCHW f32 in / NCHW f32 out (PyTorch convention).
# ---------------------------------------------------------------------------
def basic_block_ibn_a(x_nchw, p):
    xf = jnp.transpose(x_nchw, (0, 2, 3, 1))          # NCHW -> NHWC
    N, H, W, C = xf.shape
    half = C // 2

    # bf16 activations / weights (f32 MXU accumulation inside the kernel).
    x = xf.astype(jnp.bfloat16)
    # HWIO (3,3,Cin,Cout) -> (dh, dw*Cin+ci, co): taps packed into K.
    w1p = p["w1"].reshape(3, 3 * C, C).astype(jnp.bfloat16)
    w2p = p["w2"].reshape(3, 3 * C, C).astype(jnp.bfloat16)

    # Fold eval-mode BN into per-channel scale/shift; merge all per-channel
    # affine params into ONE (8, C) f32 array (single tiny DMA, 8-row aligned).
    bn1_s = p["bn1_gamma"] * jax.lax.rsqrt(p["bn1_var"] + EPS)
    bn1_b = p["bn1_beta"] - p["bn1_mean"] * bn1_s
    bn2_s = p["bn2_gamma"] * jax.lax.rsqrt(p["bn2_var"] + EPS)
    bn2_b = p["bn2_beta"] - p["bn2_mean"] * bn2_s
    zh = jnp.zeros((half,), jnp.float32)
    zc = jnp.zeros((C,), jnp.float32)
    aff = jnp.stack([
        jnp.concatenate([p["in_gamma"], zh]),   # 0: IN gamma (first half)
        jnp.concatenate([p["in_beta"], zh]),    # 1: IN beta
        jnp.concatenate([zh, bn1_s]),           # 2: BN1 scale (second half)
        jnp.concatenate([zh, bn1_b]),           # 3: BN1 shift
        bn2_s,                                  # 4: BN2 scale
        bn2_b,                                  # 5: BN2 shift
        zc, zc,                                 # 6,7: pad to a sublane tile
    ], axis=0)

    kern = functools.partial(_fused_block_kernel, H=H, W=W, C=C, half=half)
    out = pl.pallas_call(
        kern,
        out_shape=jax.ShapeDtypeStruct((N, H * W, C), jnp.float32),
        grid=(N,),
        in_specs=[
            pl.BlockSpec((1, H, W, C), lambda n: (n, 0, 0, 0)),   # x
            pl.BlockSpec((3, 3 * C, C), lambda n: (0, 0, 0)),     # w1 packed
            pl.BlockSpec((3, 3 * C, C), lambda n: (0, 0, 0)),     # w2 packed
            pl.BlockSpec((8, C), lambda n: (0, 0)),               # affine
        ],
        out_specs=pl.BlockSpec((1, H * W, C), lambda n: (n, 0, 0)),
        scratch_shapes=[
            pltpu.VMEM((H + 2, W, 3 * C), jnp.bfloat16),  # packed patches
        ],
        compiler_params=pltpu.CompilerParams(
            dimension_semantics=("parallel",)),
    )(x, w1p, w2p, aff)

    out = out.reshape(N, H, W, C)                     # free metadata reshape
    return jnp.transpose(out, (0, 3, 1, 2))           # NHWC -> NCHW


# ---------------------------------------------------------------------------
# Pure-JAX reference (same eval-mode semantics) for a numerical sanity check.
# ---------------------------------------------------------------------------
def reference(x_nchw, p):
    x = jnp.transpose(x_nchw, (0, 2, 3, 1))
    dn = ("NHWC", "HWIO", "NHWC")
    out = jax.lax.conv_general_dilated(x, p["w1"], (1, 1), "SAME",
                                       dimension_numbers=dn)
    half = x.shape[-1] // 2
    xin = out[..., :half]
    mu = jnp.mean(xin, axis=(1, 2), keepdims=True)
    var = jnp.mean((xin - mu) ** 2, axis=(1, 2), keepdims=True)
    xin = (xin - mu) / jnp.sqrt(var + EPS) * p["in_gamma"] + p["in_beta"]
    xbn = ((out[..., half:] - p["bn1_mean"]) / jnp.sqrt(p["bn1_var"] + EPS)
           * p["bn1_gamma"] + p["bn1_beta"])
    out = jnp.maximum(jnp.concatenate([xin, xbn], axis=-1), 0.0)
    out = jax.lax.conv_general_dilated(out, p["w2"], (1, 1), "SAME",
                                       dimension_numbers=dn)
    out = ((out - p["bn2_mean"]) / jnp.sqrt(p["bn2_var"] + EPS)
           * p["bn2_gamma"] + p["bn2_beta"])
    out = jnp.maximum(out + x, 0.0)
    return jnp.transpose(out, (0, 3, 1, 2))


if __name__ == "__main__":
    # inplanes = planes = 8, stride = 1, downsample = None
    N, C, H, W = 2, 8, 16, 16
    half = C // 2

    key = jax.random.PRNGKey(0)
    ks = jax.random.split(key, 13)
    x = jax.random.normal(ks[0], (N, C, H, W), jnp.float32)

    params = {
        # conv weights stored directly in HWIO (3, 3, Cin, Cout)
        "w1": 0.1 * jax.random.normal(ks[1], (3, 3, C, C), jnp.float32),
        "w2": 0.1 * jax.random.normal(ks[2], (3, 3, C, C), jnp.float32),
        # IBN_a: InstanceNorm affine params (first half of channels)
        "in_gamma": 1.0 + 0.1 * jax.random.normal(ks[3], (half,), jnp.float32),
        "in_beta": 0.1 * jax.random.normal(ks[4], (half,), jnp.float32),
        # IBN_a: BatchNorm params (second half, eval-mode running stats)
        "bn1_gamma": 1.0 + 0.1 * jax.random.normal(ks[5], (C - half,), jnp.float32),
        "bn1_beta": 0.1 * jax.random.normal(ks[6], (C - half,), jnp.float32),
        "bn1_mean": 0.1 * jax.random.normal(ks[7], (C - half,), jnp.float32),
        "bn1_var": 1.0 + 0.1 * jnp.abs(jax.random.normal(ks[8], (C - half,), jnp.float32)),
        # bn2 (eval-mode running stats)
        "bn2_gamma": 1.0 + 0.1 * jax.random.normal(ks[9], (C,), jnp.float32),
        "bn2_beta": 0.1 * jax.random.normal(ks[10], (C,), jnp.float32),
        "bn2_mean": 0.1 * jax.random.normal(ks[11], (C,), jnp.float32),
        "bn2_var": 1.0 + 0.1 * jnp.abs(jax.random.normal(ks[12], (C,), jnp.float32)),
    }

    out = jax.jit(basic_block_ibn_a)(x, params)
    out = jax.block_until_ready(out)

    ref = jax.block_until_ready(reference(x, params))
    assert out.shape == (N, C, H, W) and out.dtype == jnp.float32
    # Tolerance covers the bf16 activation/weight cast (inputs are exactly
    # representable only to ~2^-9 relative); accumulation is f32.
    if not jnp.allclose(out, ref, atol=3e-2, rtol=3e-2):
        raise AssertionError("Pallas output does not match JAX reference")

    print("KERNEL_OK")
</pallas_src>

<mosaic_0001>
module attributes {stable_mosaic.version = 11 : i64} {
  func.func @_fused_block_kernel(%arg0: i32, %arg1: memref<1x16x16x8xbf16, #tpu.memory_space<vmem>>, %arg2: memref<3x24x8xbf16, #tpu.memory_space<vmem>>, %arg3: memref<3x24x8xbf16, #tpu.memory_space<vmem>>, %arg4: memref<8x8xf32, #tpu.memory_space<vmem>>, %arg5: memref<1x256x8xf32, #tpu.memory_space<vmem>>, %arg6: memref<18x16x24xbf16, #tpu.memory_space<vmem>>) attributes {dimension_semantics = [#tpu.dimension_semantics<parallel>], iteration_bounds = array<i64: 2>, scalar_prefetch = 0 : i64, scratch_operands = 1 : i64, tpu.core_type = #tpu.core_type<tc>, window_params = [{transform_indices = @transform_0, window_bounds = array<i64: 1, 16, 16, 8>}, {pipeline_mode = #tpu.pipeline_mode<synchronous>, transform_indices = @transform_1, window_bounds = array<i64: 3, 24, 8>}, {pipeline_mode = #tpu.pipeline_mode<synchronous>, transform_indices = @transform_2, window_bounds = array<i64: 3, 24, 8>}, {pipeline_mode = #tpu.pipeline_mode<synchronous>, transform_indices = @transform_3, window_bounds = array<i64: 8, 8>}, {transform_indices = @transform_4, window_bounds = array<i64: 1, 256, 8>}]} {
    %cst = arith.constant 0.000000e+00 : bf16
    %0 = vector.broadcast %cst : bf16 to vector<18x16x24xbf16>
    %c0 = arith.constant 0 : index
    %c0_0 = arith.constant 0 : index
    %c0_1 = arith.constant 0 : index
    %1 = vector.load %arg6[%c0, %c0_0, %c0_1] : memref<18x16x24xbf16, #tpu.memory_space<vmem>>, vector<18x16x24xbf16>
    tpu.vector_store %arg6[%c0, %c0_0, %c0_1], %0 {strides = array<i32>} : memref<18x16x24xbf16, #tpu.memory_space<vmem>>, vector<18x16x24xbf16>,
    %c0_2 = arith.constant 0 : index
    %c0_3 = arith.constant 0 : index
    %2 = vector.load %arg4[%c0_2, %c0_3] : memref<8x8xf32, #tpu.memory_space<vmem>>, vector<8x8xf32>
    %c0_4 = arith.constant 0 : index
    %c0_5 = arith.constant 0 : index
    %c0_6 = arith.constant 0 : index
    %c0_7 = arith.constant 0 : index
    %3 = vector.load %arg1[%c0_4, %c0_5, %c0_6, %c0_7] : memref<1x16x16x8xbf16, #tpu.memory_space<vmem>>, vector<1x16x16x8xbf16>
    %4 = vector.shape_cast %3 : vector<1x16x16x8xbf16> to vector<16x16x8xbf16>
    %5 = vector.extract_strided_slice %4 {offsets = [0, 0, 0], sizes = [16, 15, 8], strides = [1, 1, 1]} : vector<16x16x8xbf16> to vector<16x15x8xbf16>
    %c1 = arith.constant 1 : index
    %c1_8 = arith.constant 1 : index
    %c0_9 = arith.constant 0 : index
    %6 = vector.load %arg6[%c1, %c1_8, %c0_9] : memref<18x16x24xbf16, #tpu.memory_space<vmem>>, vector<16x15x8xbf16>
    tpu.vector_store %arg6[%c1, %c1_8, %c0_9], %5 {strides = array<i32>} : memref<18x16x24xbf16, #tpu.memory_space<vmem>>, vector<16x15x8xbf16>,
    %c1_10 = arith.constant 1 : index
    %c0_11 = arith.constant 0 : index
    %c8 = arith.constant 8 : index
    %7 = vector.load %arg6[%c1_10, %c0_11, %c8] : memref<18x16x24xbf16, #tpu.memory_space<vmem>>, vector<16x16x8xbf16>
    tpu.vector_store %arg6[%c1_10, %c0_11, %c8], %4 {strides = array<i32>} : memref<18x16x24xbf16, #tpu.memory_space<vmem>>, vector<16x16x8xbf16>,
    %8 = vector.extract_strided_slice %4 {offsets = [0, 1, 0], sizes = [16, 15, 8], strides = [1, 1, 1]} : vector<16x16x8xbf16> to vector<16x15x8xbf16>
    %c1_12 = arith.constant 1 : index
    %c0_13 = arith.constant 0 : index
    %c16 = arith.constant 16 : index
    %9 = vector.load %arg6[%c1_12, %c0_13, %c16] : memref<18x16x24xbf16, #tpu.memory_space<vmem>>, vector<16x15x8xbf16>
    tpu.vector_store %arg6[%c1_12, %c0_13, %c16], %8 {strides = array<i32>} : memref<18x16x24xbf16, #tpu.memory_space<vmem>>, vector<16x15x8xbf16>,
    %c0_14 = arith.constant 0 : index
    %c0_15 = arith.constant 0 : index
    %c0_16 = arith.constant 0 : index
    %10 = vector.load %arg6[%c0_14, %c0_15, %c0_16] : memref<18x16x24xbf16, #tpu.memory_space<vmem>>, vector<18x16x24xbf16>
    %11 = vector.shape_cast %10 : vector<18x16x24xbf16> to vector<288x24xbf16>
    %12 = vector.extract_strided_slice %11 {offsets = [0, 0], sizes = [256, 24], strides = [1, 1]} : vector<288x24xbf16> to vector<256x24xbf16>
    %c0_17 = arith.constant 0 : index
    %c0_18 = arith.constant 0 : index
    %c0_19 = arith.constant 0 : index
    %13 = vector.load %arg2[%c0_17, %c0_18, %c0_19] : memref<3x24x8xbf16, #tpu.memory_space<vmem>>, vector<1x24x8xbf16>
    %14 = vector.shape_cast %13 : vector<1x24x8xbf16> to vector<24x8xbf16>
    %cst_20 = arith.constant dense<0.000000e+00> : vector<256x8xf32>
    %15 = tpu.matmul %12, %14, %cst_20 {dimension_numbers = #tpu.dot_dimension_numbers<[1], [0], [0], [1], [0, 0, 1, 1], [], []>} : vector<256x24xbf16>, vector<24x8xbf16>, vector<256x8xf32> -> vector<256x8xf32>
    %16 = vector.extract_strided_slice %11 {offsets = [16, 0], sizes = [256, 24], strides = [1, 1]} : vector<288x24xbf16> to vector<256x24xbf16>
    %c1_21 = arith.constant 1 : index
    %c0_22 = arith.constant 0 : index
    %c0_23 = arith.constant 0 : index
    %17 = vector.load %arg2[%c1_21, %c0_22, %c0_23] : memref<3x24x8xbf16, #tpu.memory_space<vmem>>, vector<1x24x8xbf16>
    %18 = vector.shape_cast %17 : vector<1x24x8xbf16> to vector<24x8xbf16>
    %cst_24 = arith.constant dense<0.000000e+00> : vector<256x8xf32>
    %19 = tpu.matmul %16, %18, %cst_24 {dimension_numbers = #tpu.dot_dimension_numbers<[1], [0], [0], [1], [0, 0, 1, 1], [], []>} : vector<256x24xbf16>, vector<24x8xbf16>, vector<256x8xf32> -> vector<256x8xf32>
    %20 = arith.addf %15, %19 : vector<256x8xf32>
    %21 = vector.extract_strided_slice %11 {offsets = [32, 0], sizes = [256, 24], strides = [1, 1]} : vector<288x24xbf16> to vector<256x24xbf16>
    %c2 = arith.constant 2 : index
    %c0_25 = arith.constant 0 : index
    %c0_26 = arith.constant 0 : index
    %22 = vector.load %arg2[%c2, %c0_25, %c0_26] : memref<3x24x8xbf16, #tpu.memory_space<vmem>>, vector<1x24x8xbf16>
    %23 = vector.shape_cast %22 : vector<1x24x8xbf16> to vector<24x8xbf16>
    %cst_27 = arith.constant dense<0.000000e+00> : vector<256x8xf32>
    %24 = tpu.matmul %21, %23, %cst_27 {dimension_numbers = #tpu.dot_dimension_numbers<[1], [0], [0], [1], [0, 0, 1, 1], [], []>} : vector<256x24xbf16>, vector<24x8xbf16>, vector<256x8xf32> -> vector<256x8xf32>
    %25 = arith.addf %20, %24 : vector<256x8xf32>
    %cst_28 = arith.constant dense<0.000000e+00> : vector<8xf32>
    %26 = vector.multi_reduction <add>, %25, %cst_28 [0] : vector<256x8xf32> to vector<8xf32>
    %27 = vector.shape_cast %26 : vector<8xf32> to vector<1x8xf32>
    %28 = arith.mulf %25, %25 : vector<256x8xf32>
    %cst_29 = arith.constant dense<0.000000e+00> : vector<8xf32>
    %29 = vector.multi_reduction <add>, %28, %cst_29 [0] : vector<256x8xf32> to vector<8xf32>
    %30 = vector.shape_cast %29 : vector<8xf32> to vector<1x8xf32>
    %cst_30 = arith.constant 3.906250e-03 : f32
    %31 = vector.broadcast %cst_30 : f32 to vector<1x8xf32>
    %32 = arith.mulf %27, %31 : vector<1x8xf32>
    %cst_31 = arith.constant 3.906250e-03 : f32
    %33 = vector.broadcast %cst_31 : f32 to vector<1x8xf32>
    %34 = arith.mulf %30, %33 : vector<1x8xf32>
    %35 = arith.mulf %32, %32 : vector<1x8xf32>
    %36 = arith.subf %34, %35 : vector<1x8xf32>
    %cst_32 = arith.constant 9.99999974E-6 : f32
    %37 = vector.broadcast %cst_32 : f32 to vector<1x8xf32>
    %38 = arith.addf %36, %37 : vector<1x8xf32>
    %39 = math.rsqrt %38 : vector<1x8xf32>
    %40 = vector.extract_strided_slice %2 {offsets = [0, 0], sizes = [1, 8], strides = [1, 1]} : vector<8x8xf32> to vector<1x8xf32>
    %41 = arith.mulf %39, %40 : vector<1x8xf32>
    %42 = vector.extract_strided_slice %2 {offsets = [1, 0], sizes = [1, 8], strides = [1, 1]} : vector<8x8xf32> to vector<1x8xf32>
    %43 = arith.mulf %32, %41 : vector<1x8xf32>
    %44 = arith.subf %42, %43 : vector<1x8xf32>
    %45 = tpu.iota {dimensions = array<i32: 1>} : vector<1x8xi32>
    %c4_i32 = arith.constant 4 : i32
    %46 = vector.broadcast %c4_i32 : i32 to vector<1x8xi32>
    %47 = arith.cmpi slt, %45, %46 : vector<1x8xi32>
    %48 = vector.extract_strided_slice %2 {offsets = [2, 0], sizes = [1, 8], strides = [1, 1]} : vector<8x8xf32> to vector<1x8xf32>
    %49 = arith.select %47, %41, %48 : vector<1x8xi1>, vector<1x8xf32>
    %50 = vector.extract_strided_slice %2 {offsets = [3, 0], sizes = [1, 8], strides = [1, 1]} : vector<8x8xf32> to vector<1x8xf32>
    %51 = arith.select %47, %44, %50 : vector<1x8xi1>, vector<1x8xf32>
    %52 = vector.broadcast %49 : vector<1x8xf32> to vector<256x8xf32>
    %53 = arith.mulf %25, %52 : vector<256x8xf32>
    %54 = vector.broadcast %51 : vector<1x8xf32> to vector<256x8xf32>
    %55 = arith.addf %53, %54 : vector<256x8xf32>
    %cst_33 = arith.constant 0.000000e+00 : f32
    %56 = vector.broadcast %cst_33 : f32 to vector<256x8xf32>
    %57 = arith.maximumf %55, %56 : vector<256x8xf32>
    %58 = arith.truncf %57 : vector<256x8xf32> to vector<256x8xbf16>
    %59 = vector.shape_cast %58 : vector<256x8xbf16> to vector<16x16x8xbf16>
    %60 = vector.extract_strided_slice %59 {offsets = [0, 0, 0], sizes = [16, 15, 8], strides = [1, 1, 1]} : vector<16x16x8xbf16> to vector<16x15x8xbf16>
    %c1_34 = arith.constant 1 : index
    %c1_35 = arith.constant 1 : index
    %c0_36 = arith.constant 0 : index
    %61 = vector.load %arg6[%c1_34, %c1_35, %c0_36] : memref<18x16x24xbf16, #tpu.memory_space<vmem>>, vector<16x15x8xbf16>
    tpu.vector_store %arg6[%c1_34, %c1_35, %c0_36], %60 {strides = array<i32>} : memref<18x16x24xbf16, #tpu.memory_space<vmem>>, vector<16x15x8xbf16>,
    %c1_37 = arith.constant 1 : index
    %c0_38 = arith.constant 0 : index
    %c8_39 = arith.constant 8 : index
    %62 = vector.load %arg6[%c1_37, %c0_38, %c8_39] : memref<18x16x24xbf16, #tpu.memory_space<vmem>>, vector<16x16x8xbf16>
    tpu.vector_store %arg6[%c1_37, %c0_38, %c8_39], %59 {strides = array<i32>} : memref<18x16x24xbf16, #tpu.memory_space<vmem>>, vector<16x16x8xbf16>,
    %63 = vector.extract_strided_slice %59 {offsets = [0, 1, 0], sizes = [16, 15, 8], strides = [1, 1, 1]} : vector<16x16x8xbf16> to vector<16x15x8xbf16>
    %c1_40 = arith.constant 1 : index
    %c0_41 = arith.constant 0 : index
    %c16_42 = arith.constant 16 : index
    %64 = vector.load %arg6[%c1_40, %c0_41, %c16_42] : memref<18x16x24xbf16, #tpu.memory_space<vmem>>, vector<16x15x8xbf16>
    tpu.vector_store %arg6[%c1_40, %c0_41, %c16_42], %63 {strides = array<i32>} : memref<18x16x24xbf16, #tpu.memory_space<vmem>>, vector<16x15x8xbf16>,
    %c0_43 = arith.constant 0 : index
    %c0_44 = arith.constant 0 : index
    %c0_45 = arith.constant 0 : index
    %65 = vector.load %arg6[%c0_43, %c0_44, %c0_45] : memref<18x16x24xbf16, #tpu.memory_space<vmem>>, vector<18x16x24xbf16>
    %66 = vector.shape_cast %65 : vector<18x16x24xbf16> to vector<288x24xbf16>
    %67 = vector.extract_strided_slice %66 {offsets = [0, 0], sizes = [256, 24], strides = [1, 1]} : vector<288x24xbf16> to vector<256x24xbf16>
    %c0_46 = arith.constant 0 : index
    %c0_47 = arith.constant 0 : index
    %c0_48 = arith.constant 0 : index
    %68 = vector.load %arg3[%c0_46, %c0_47, %c0_48] : memref<3x24x8xbf16, #tpu.memory_space<vmem>>, vector<1x24x8xbf16>
    %69 = vector.shape_cast %68 : vector<1x24x8xbf16> to vector<24x8xbf16>
    %cst_49 = arith.constant dense<0.000000e+00> : vector<256x8xf32>
    %70 = tpu.matmul %67, %69, %cst_49 {dimension_numbers = #tpu.dot_dimension_numbers<[1], [0], [0], [1], [0, 0, 1, 1], [], []>} : vector<256x24xbf16>, vector<24x8xbf16>, vector<256x8xf32> -> vector<256x8xf32>
    %71 = vector.extract_strided_slice %66 {offsets = [16, 0], sizes = [256, 24], strides = [1, 1]} : vector<288x24xbf16> to vector<256x24xbf16>
    %c1_50 = arith.constant 1 : index
    %c0_51 = arith.constant 0 : index
    %c0_52 = arith.constant 0 : index
    %72 = vector.load %arg3[%c1_50, %c0_51, %c0_52] : memref<3x24x8xbf16, #tpu.memory_space<vmem>>, vector<1x24x8xbf16>
    %73 = vector.shape_cast %72 : vector<1x24x8xbf16> to vector<24x8xbf16>
    %cst_53 = arith.constant dense<0.000000e+00> : vector<256x8xf32>
    %74 = tpu.matmul %71, %73, %cst_53 {dimension_numbers = #tpu.dot_dimension_numbers<[1], [0], [0], [1], [0, 0, 1, 1], [], []>} : vector<256x24xbf16>, vector<24x8xbf16>, vector<256x8xf32> -> vector<256x8xf32>
    %75 = arith.addf %70, %74 : vector<256x8xf32>
    %76 = vector.extract_strided_slice %66 {offsets = [32, 0], sizes = [256, 24], strides = [1, 1]} : vector<288x24xbf16> to vector<256x24xbf16>
    %c2_54 = arith.constant 2 : index
    %c0_55 = arith.constant 0 : index
    %c0_56 = arith.constant 0 : index
    %77 = vector.load %arg3[%c2_54, %c0_55, %c0_56] : memref<3x24x8xbf16, #tpu.memory_space<vmem>>, vector<1x24x8xbf16>
    %78 = vector.shape_cast %77 : vector<1x24x8xbf16> to vector<24x8xbf16>
    %cst_57 = arith.constant dense<0.000000e+00> : vector<256x8xf32>
    %79 = tpu.matmul %76, %78, %cst_57 {dimension_numbers = #tpu.dot_dimension_numbers<[1], [0], [0], [1], [0, 0, 1, 1], [], []>} : vector<256x24xbf16>, vector<24x8xbf16>, vector<256x8xf32> -> vector<256x8xf32>
    %80 = arith.addf %75, %79 : vector<256x8xf32>
    %81 = vector.shape_cast %4 : vector<16x16x8xbf16> to vector<256x8xbf16>
    %82 = arith.extf %81 : vector<256x8xbf16> to vector<256x8xf32>
    %83 = vector.extract_strided_slice %2 {offsets = [4, 0], sizes = [1, 8], strides = [1, 1]} : vector<8x8xf32> to vector<1x8xf32>
    %84 = vector.broadcast %83 : vector<1x8xf32> to vector<256x8xf32>
    %85 = arith.mulf %80, %84 : vector<256x8xf32>
    %86 = vector.extract_strided_slice %2 {offsets = [5, 0], sizes = [1, 8], strides = [1, 1]} : vector<8x8xf32> to vector<1x8xf32>
    %87 = vector.broadcast %86 : vector<1x8xf32> to vector<256x8xf32>
    %88 = arith.addf %85, %87 : vector<256x8xf32>
    %89 = arith.addf %88, %82 : vector<256x8xf32>
    %cst_58 = arith.constant 0.000000e+00 : f32
    %90 = vector.broadcast %cst_58 : f32 to vector<256x8xf32>
    %91 = arith.maximumf %89, %90 : vector<256x8xf32>
    %c0_59 = arith.constant 0 : index
    %c0_60 = arith.constant 0 : index
    %c0_61 = arith.constant 0 : index
    %92 = vector.load %arg5[%c0_59, %c0_60, %c0_61] : memref<1x256x8xf32, #tpu.memory_space<vmem>>, vector<1x256x8xf32>
    %93 = vector.shape_cast %92 : vector<1x256x8xf32> to vector<256x8xf32>
    %94 = vector.shape_cast %91 : vector<256x8xf32> to vector<1x256x8xf32>
    tpu.vector_store %arg5[%c0_59, %c0_60, %c0_61], %94 {strides = array<i32>} : memref<1x256x8xf32, #tpu.memory_space<vmem>>, vector<1x256x8xf32>,
    return
  }
  func.func @transform_0(%arg0: i32) -> (i32, i32, i32, i32) {
    %c0_i32 = arith.constant 0 : i32
    %c0_i32_0 = arith.constant 0 : i32
    %c0_i32_1 = arith.constant 0 : i32
    %c0_i32_2 = arith.constant 0 : i32
    return %arg0, %c0_i32, %c0_i32_0, %c0_i32_1 : i32, i32, i32, i32
  }
  func.func @transform_1(%arg0: i32) -> (i32, i32, i32) {
    %c0_i32 = arith.constant 0 : i32
    %c0_i32_0 = arith.constant 0 : i32
    %c0_i32_1 = arith.constant 0 : i32
    %c0_i32_2 = arith.constant 0 : i32
    return %c0_i32, %c0_i32_0, %c0_i32_1 : i32, i32, i32
  }
  func.func @transform_2(%arg0: i32) -> (i32, i32, i32) {
    %c0_i32 = arith.constant 0 : i32
    %c0_i32_0 = arith.constant 0 : i32
    %c0_i32_1 = arith.constant 0 : i32
    %c0_i32_2 = arith.constant 0 : i32
    return %c0_i32, %c0_i32_0, %c0_i32_1 : i32, i32, i32
  }
  func.func @transform_3(%arg0: i32) -> (i32, i32) {
    %c0_i32 = arith.constant 0 : i32
    %c0_i32_0 = arith.constant 0 : i32
    %c0_i32_1 = arith.constant 0 : i32
    return %c0_i32, %c0_i32_0 : i32, i32
  }
  func.func @transform_4(%arg0: i32) -> (i32, i32, i32) {
    %c0_i32 = arith.constant 0 : i32
    %c0_i32_0 = arith.constant 0 : i32
    %c0_i32_1 = arith.constant 0 : i32
    return %arg0, %c0_i32, %c0_i32_0 : i32, i32, i32
  }
}

</mosaic_0001>

<bundles_post_ra>
// kernel: basic_block_ibn_a.1
= control target key start
LH: loop header
LB: loop body
LE: loop exit
PB: predicated region body
PF: predicated region fallthrough
CT: control target
= control target key end

     0   :  { %s3642_s15 = smov 0   ;;  %s4989_s0 = inlined_call_operand.vmem [shape: bf16[2,16,16,8], index: 0, kind: input, shape index: {}]   ;;  %s4990_s1 = inlined_call_operand.vmem [shape: bf16[3,24,8], index: 1, kind: input, shape index: {}]   ;;  %s4991_s2 = inlined_call_operand.vmem [shape: bf16[3,24,8], index: 2, kind: input, shape index: {}]   ;;  %s4992_s3 = inlined_call_operand.vmem [shape: f32[8,8], index: 3, kind: input, shape index: {}]   ;;  %s4993_s4 = inlined_call_operand.vmem [shape: f32[2,256,8], index: 4, kind: output, shape index: {}]  }
   0x1 LB: > { %s2926_s16 = sadd.s32 4294967295, %s3612_s15   ;;  %p2930_p0 = scmp.ge.s32.totalorder %s3612_s15, 1  ;;  %s3612_s15 = sphi %s3642_s15, %s14_s15  }
   0x2   : > { %p162_p1 = scmp.lt.s32.totalorder %s3612_s15, 3 }
   0x4   : > { %p163_p2 = pnand %p2930_p0, %p162_p1 }
   0x5   : > { %p3650_p3 = scmp.lt.s32.totalorder (!%p163_p2), %s2926_s16, 1  ;;  %vm199_vm0 = vcmask (!%p163_p2), 195584   ;;  %v3614_v0 = vmov (!%p163_p2), 0   ;;  %v3560_v1 = vld [vmem:[%s4990_s1 + $0xc] sm:$0xff] (!%p163_p2)   ;;  %v3561_v2 = vld [vmem:[%s4990_s1 + $0x14] ss:$0 sps:$4 sm:$0xff] (!%p163_p2)  }
   0x6   : > { %166 = sbr.rel (%p163_p2) target bundleno = 1142 (0x476), region = 36  ;;  %201 = vst.msk [vmem:[#allocation2 + $0x8] sm:$0xff] (!%p163_p2), %vm199_vm0, %v3614_v0  ;;  %200 = vst.msk [vmem:[#allocation2] sm:$0xff] (!%p163_p2), %vm199_vm0, %v3614_v0  ;;  %vm789_vm1 = vcmask (!%p163_p2), 1043456   ;;  %3183 = vmatprep.subr.bf16.mxu0 (!%p163_p2), %v3560_v1  ;;  %s3615_s26 = smov (!%p163_p2), 8   ;;  %v3712_v20 = vld [vmem:[%s4990_s1] sm:$0xff] (!%p163_p2)  }
   0x7   : > { %202 = vst.msk [vmem:[#allocation2 + $0x10] sm:$0xff] (!%p163_p2), %vm199_vm0, %v3614_v0  ;;  %203 = vst.msk [vmem:[#allocation2 + $0x18] sm:$0xff] (!%p163_p2), %vm199_vm0, %v3614_v0  ;;  %3184 = vmatpush3.bf16.msra.mxu0 (!%p163_p2), %v3560_v1  ;;  %v791_v6 = vsel (!%p163_p2), %vm789_vm1, %v3561_v2, 0  ;;  %s3616_s27 = smov (!%p163_p2), 16   ;;  %vm460_vm2 = vcmask (!%p163_p2), 64512   ;;  %vm559_vm5 = vcmask (!%p163_p2), 130112  }
   0x8   : > { %204 = vst.msk [vmem:[#allocation2 + $0x20] sm:$0xff] (!%p163_p2), %vm199_vm0, %v3614_v0  ;;  %205 = vst.msk [vmem:[#allocation2 + $0x28] sm:$0xff] (!%p163_p2), %vm199_vm0, %v3614_v0  ;;  %3527 = vmatprep.subr.msk.bf16.mxu0 (!%p163_p2), %vm789_vm1, %v3561_v2  ;;  %vm461_vm3 = vsmask.f32 (!%p163_p2), 7938  ;;  %vm656_vm6 = vcmask (!%p163_p2), 195712  }
   0x9   : > { %206 = vst.msk [vmem:[#allocation2 + $0x30] sm:$0xff] (!%p163_p2), %vm199_vm0, %v3614_v0  ;;  %207 = vst.msk [vmem:[#allocation2 + $0x38] sm:$0xff] (!%p163_p2), %vm199_vm0, %v3614_v0  ;;  %vm657_vm7 = vsmask.f32 (!%p163_p2), 7424 }
   0xa   : > { %208 = vst.msk [vmem:[#allocation2 + $0x40] sm:$0xff] (!%p163_p2), %vm199_vm0, %v3614_v0  ;;  %209 = vst.msk [vmem:[#allocation2 + $0x48] sm:$0xff] (!%p163_p2), %vm199_vm0, %v3614_v0 }
   0xb   : > { %210 = vst.msk [vmem:[#allocation2 + $0x50] sm:$0xff] (!%p163_p2), %vm199_vm0, %v3614_v0  ;;  %211 = vst.msk [vmem:[#allocation2 + $0x58] sm:$0xff] (!%p163_p2), %vm199_vm0, %v3614_v0  ;;  %3186 = vmatpush3.bf16.msra.mxu0 (!%p163_p2), %v791_v6 }
   0xc   : > { %212 = vst.msk [vmem:[#allocation2 + $0x60] sm:$0xff] (!%p163_p2), %vm199_vm0, %v3614_v0  ;;  %213 = vst.msk [vmem:[#allocation2 + $0x68] sm:$0xff] (!%p163_p2), %vm199_vm0, %v3614_v0  ;;  %3219 = vmatprep.subr.bf16.mxu0 (!%p163_p2), %v3712_v20 }
   0xd   : > { %214 = vst.msk [vmem:[#allocation2 + $0x70] sm:$0xff] %vm199_vm0, %v3614_v0  ;;  %215 = vst.msk [vmem:[#allocation2 + $0x78] sm:$0xff] %vm199_vm0, %v3614_v0  ;;  %s5000_s16 = smov (!%p3650_p3, %s2926_s16), 1 }
   0xe   : > { %216 = vst.msk [vmem:[#allocation2 + $0x80] sm:$0xff] %vm199_vm0, %v3614_v0  ;;  %217 = vst.msk [vmem:[#allocation2 + $0x88] sm:$0xff] %vm199_vm0, %v3614_v0  ;;  %s3073_s20 = sshll.u32 %s5000_s16, 7 }
   0xf   : > { %s3686_s25 = scalar_lea.vmem %s4989_s0, %s3073_s20  ;;  %vm3789_vm4 = vmand %vm460_vm2, %vm461_vm3 }
  0x10   : > { %v3689_v3 = vld [vmem:[%s3686_s25] sm:$0xff]   ;;  %v3692_v4 = vld [vmem:[%s3686_s25 + $0x10] sm:$0xff]   ;;  %v221_v5 = vld [vmem:[%s3686_s25 + $0x8] sm:$0xff]  }
  0x11   : > { %511 = vrot.lane.b32.xlu0 %v3689_v3, %s3615_s26  ;;  %515 = vrot.lane.b32.xlu1 %v3692_v4, %s3615_s26  ;;  %v332_v7 = vshrl.u32 %v3689_v3, 16  ;;  %v335_v8 = vshll.u32 %v3689_v3, 16  ;;  %v342_v9 = vshll.u32 %v221_v5, 16  ;;  %v225_v10 = vld [vmem:[%s3686_s25 + $0x18] sm:$0xff]   ;;  %v339_v12 = vshrl.u32 %v221_v5, 16  ;;  %v227_v16 = vld [vmem:[%s3686_s25 + $0x20] sm:$0xff]   ;;  %vm3908_vm8 = vmand %vm656_vm6, %vm657_vm7 }
  0x12   : > { %v349_v13 = vshll.u32 %v3692_v4, 16  ;;  %v346_v18 = vshrl.u32 %v3692_v4, 16  ;;  %v356_v21 = vshll.u32 %v225_v10, 16  ;;  %v229_v22 = vld [vmem:[%s3686_s25 + $0x28] sm:$0xff]   ;;  %v353_v24 = vshrl.u32 %v225_v10, 16  ;;  %v231_v27 = vld [vmem:[%s3686_s25 + $0x30] sm:$0xff]  }
  0x13   : > { %v576_v11 = vrot.slane %v335_v8, 1  ;;  %v578_v14 = vrot.slane %v342_v9, 1  ;;  %v363_v26 = vshll.u32 %v227_v16, 16  ;;  %v360_v29 = vshrl.u32 %v227_v16, 16  ;;  %v233_v31 = vld [vmem:[%s3686_s25 + $0x38] sm:$0xff]   ;;  %v235_v36 = vld [vmem:[%s3686_s25 + $0x40] sm:$0xff]  }
  0x14   : > { %v580_v19 = vrot.slane %v349_v13, 1  ;;  %v582_v25 = vrot.slane %v356_v21, 1  ;;  %v370_v32 = vshll.u32 %v229_v22, 16  ;;  %v334_v33 = vrot.slane %v332_v7, 7  ;;  %v3726_v45 = vld [vmem:[%s3686_s25 + $0x48] sm:$0xff]   ;;  %v3734_v51 = vld [vmem:[%s3686_s25 + $0x50] sm:$0xff]  }
  0x15   : > { %513 = vrot.lane.b32.xlu0 %v221_v5, %s3615_s26  ;;  %v577_v15 = vor.u32 %v576_v11, %v332_v7  ;;  %v579_v17 = vor.u32 %v578_v14, %v339_v12  ;;  %v584_v30 = vrot.slane %v363_v26, 1  ;;  %v341_v34 = vrot.slane %v339_v12, 7  ;;  %v3741_v56 = vld [vmem:[%s3686_s25 + $0x58] sm:$0xff]   ;;  %v3745_v60 = vld [vmem:[%s3686_s25 + $0x60] sm:$0xff]   ;;  %v3752_v0 = vld [vmem:[%s3686_s25 + $0x68] sm:$0xff]  }
  0x16   : > { %v581_v23 = vor.u32 %v580_v19, %v346_v18  ;;  %v583_v28 = vor.u32 %v582_v25, %v353_v24  ;;  %v348_v35 = vrot.slane %v346_v18, 7  ;;  %v355_v37 = vrot.slane %v353_v24, 7  ;;  %v3759_v4 = vld [vmem:[%s3686_s25 + $0x70] sm:$0xff]   ;;  %v3772_v14 = vld [vmem:[%s3686_s25 + $0x78] sm:$0xff]   ;;  %v463_v25 = vld [vmem:[#allocation2 + $0x8] sm:$0xff] }
  0x17   : > { %608 = vrot.lane.b32.xlu1 %v577_v15, %s3616_s27  ;;  %v367_v38 = vshrl.u32 %v229_v22, 16  ;;  %v377_v39 = vshll.u32 %v231_v27, 16  ;;  %v585_v40 = vor.u32 %v584_v30, %v360_v29  ;;  %v586_v41 = vrot.slane %v370_v32, 1  ;;  %v466_v30 = vld [vmem:[#allocation2 + $0x10] sm:$0xff] }
  0x18   : > { %v374_v42 = vshrl.u32 %v231_v27, 16  ;;  %v362_v43 = vrot.slane %v360_v29, 7  ;;  %v384_v46 = vshll.u32 %v233_v31, 16  ;;  %v3728_v47 = vor.u32 %v335_v8, %v334_v33  ;;  %v469_v29 = vld [vmem:[#allocation2 + $0x18] sm:$0xff] }
  0x19   : > { %517 = vrot.lane.b32.xlu0 %v225_v10, %s3615_s26  ;;  %v369_v44 = vrot.slane %v367_v38, 7  ;;  %v3730_v48 = vor.u32 %v342_v9, %v341_v34  ;;  %v381_v50 = vshrl.u32 %v233_v31, 16  ;;  %v3736_v52 = vor.u32 %v349_v13, %v348_v35  ;;  %v472_v35 = vld [vmem:[#allocation2 + $0x20] sm:$0xff] }
  0x1a   : > { %v376_v49 = vrot.slane %v374_v42, 7  ;;  %v3738_v53 = vor.u32 %v356_v21, %v355_v37  ;;  %v588_v54 = vrot.slane %v377_v39, 1  ;;  %v391_v55 = vshll.u32 %v235_v36, 16  ;;  %v478_v37 = vld [vmem:[#allocation2 + $0x30] sm:$0xff] }
  0x1b   : > { %610 = vrot.lane.b32.xlu1 %v579_v17, %s3616_s27  ;;  %v587_v57 = vor.u32 %v586_v41, %v367_v38  ;;  %v383_v58 = vrot.slane %v381_v50, 7  ;;  %v388_v59 = vshrl.u32 %v235_v36, 16  ;;  %v3747_v61 = vor.u32 %v363_v26, %v362_v43  ;;  %v484_v43 = vld [vmem:[#allocation2 + $0x40] sm:$0xff] }
  0x1c   : > { %v3749_v62 = vor.u32 %v370_v32, %v369_v44  ;;  %v590_v63 = vrot.slane %v384_v46, 1  ;;  %v3755_v1 = vor.u32 %v377_v39, %v376_v49  ;;  %v395_v3 = vshrl.u32 %v3726_v45, 16  ;;  %v487_v44 = vld [vmem:[#allocation2 + $0x48] sm:$0xff] }
  0x1d   : > { %519 = vrot.lane.b32.xlu0 %v227_v16, %s3615_s26  ;;  %v390_v2 = vrot.slane %v388_v59, 7  ;;  %v589_v5 = vor.u32 %v588_v54, %v374_v42  ;;  %v592_v6 = vrot.slane %v391_v55, 1  ;;  %v402_v7 = vshrl.u32 %v3734_v51, 16  ;;  %v481_v42 = vld [vmem:[#allocation2 + $0x38] sm:$0xff] }
  0x1e   : > { %v3763_v8 = vor.u32 %v384_v46, %v383_v58  ;;  %v397_v9 = vrot.slane %v395_v3, 7  ;;  %v409_v10 = vshrl.u32 %v3741_v56, 16  ;;  %v591_v11 = vor.u32 %v590_v63, %v381_v50  ;;  %v496_v58 = vld [vmem:[#allocation2 + $0x60] sm:$0xff] }
  0x1f   : > { %612 = vrot.lane.b32.xlu1 %v581_v23, %s3616_s27  ;;  %v404_v12 = vrot.slane %v402_v7, 7  ;;  %v416_v13 = vshrl.u32 %v3745_v60, 16  ;;  %v3775_v15 = vor.u32 %v391_v55, %v390_v2  ;;  %v398_v16 = vshll.u32 %v3726_v45, 16  ;;  %v490_v55 = vld [vmem:[#allocation2 + $0x50] sm:$0xff]  ;;  %v499_v2 = vld [vmem:[#allocation2 + $0x68] sm:$0xff] }
  0x20   : > { %v411_v17 = vrot.slane %v409_v10, 7  ;;  %v423_v18 = vshrl.u32 %v3752_v0, 16  ;;  %v3781_v19 = vor.u32 %v592_v6, %v388_v59  ;;  %v405_v21 = vshll.u32 %v3734_v51, 16 }
  0x21   : > { %521 = vrot.lane.b32.xlu0 %v229_v22, %s3615_s26  ;;  %v418_v22 = vrot.slane %v416_v13, 7  ;;  %v430_v23 = vshrl.u32 %v3759_v4, 16  ;;  %v400_v26 = vor.u32 %v398_v16, %v397_v9  ;;  %v419_v32 = vshll.u32 %v3745_v60, 16 }
  0x22   : > { %v426_v33 = vshll.u32 %v3752_v0, 16  ;;  %v433_v39 = vshll.u32 %v3759_v4, 16  ;;  %v464_v41 = vsel %vm3789_vm4, %v3728_v47, %v463_v25  ;;  %v594_v46 = vrot.slane %v398_v16, 1 }
  0x23   : > { %614 = vrot.lane.b32.xlu1 %v583_v28, %s3616_s27  ;;  %v425_v28 = vrot.slane %v423_v18, 7  ;;  %v432_v34 = vrot.slane %v430_v23, 7  ;;  %v421_v49 = vor.u32 %v419_v32, %v418_v22  ;;  %465 = vst [vmem:[#allocation2 + $0x8] sm:$0xff] %v464_v41  ;;  %v470_v54 = vsel %vm3789_vm4, %v3736_v52, %v469_v29  ;;  %v505_v22 = vld [vmem:[#allocation2 + $0x78] sm:$0xff] }
  0x24   : > { %471 = vst [vmem:[#allocation2 + $0x18] sm:$0xff] %v470_v54  ;;  %v467_v63 = vsel %vm3789_vm4, %v3730_v48, %v466_v30  ;;  %v473_v52 = vsel %vm3789_vm4, %v3738_v53, %v472_v35  ;;  %v479_v9 = vsel %vm3789_vm4, %v3749_v62, %v478_v37  ;;  %v482_v48 = vsel %vm3789_vm4, %v3755_v1, %v481_v42 }
  0x25   : > { %523 = vrot.lane.b32.xlu0 %v231_v27, %s3615_s26  ;;  %v412_v27 = vshll.u32 %v3741_v56, 16  ;;  %v428_v50 = vor.u32 %v426_v33, %v425_v28  ;;  %v435_v47 = vor.u32 %v433_v39, %v432_v34  ;;  %468 = vst [vmem:[#allocation2 + $0x10] sm:$0xff] %v467_v63  ;;  %474 = vst [vmem:[#allocation2 + $0x20] sm:$0xff] %v473_v52 }
  0x26   : > { %v485_v53 = vsel %vm3789_vm4, %v3763_v8, %v484_v43  ;;  %480 = vst [vmem:[#allocation2 + $0x30] sm:$0xff] %v479_v9  ;;  %483 = vst [vmem:[#allocation2 + $0x38] sm:$0xff] %v482_v48  ;;  %v491_v62 = vsel %vm3789_vm4, %v400_v26, %v490_v55  ;;  %v595_v16 = vor.u32 %v594_v46, %v395_v3 }
  0x27   : > { %616 = vrot.lane.b32.xlu1 %v585_v40, %s3616_s27  ;;  %v414_v38 = vor.u32 %v412_v27, %v411_v17  ;;  %v437_v40 = vshrl.u32 %v3772_v14, 16  ;;  %486 = vst [vmem:[#allocation2 + $0x40] sm:$0xff] %v485_v53  ;;  %492 = vst [vmem:[#allocation2 + $0x50] sm:$0xff] %v491_v62  ;;  %v596_v17 = vrot.slane %v405_v21, 1  ;;  %v506_v26 = vsel %vm3789_vm4, %v435_v47, %v505_v22 }
  0x28   : > { %507 = vst [vmem:[#allocation2 + $0x78] sm:$0xff] %v506_v26  ;;  %v598_v3 = vrot.slane %v412_v27, 1  ;;  %v602_v27 = vrot.slane %v426_v33, 1 }
  0x29   : > { %525 = vrot.lane.b32.xlu0 %v233_v31, %s3615_s26  ;;  %v407_v31 = vor.u32 %v405_v21, %v404_v12  ;;  %v439_v59 = vrot.slane %v437_v40, 7  ;;  %v497_v8 = vsel %vm3789_vm4, %v414_v38, %v496_v58  ;;  %v500_v12 = vsel %vm3789_vm4, %v421_v49, %v499_v2 }
  0x2a   : > { %498 = vst [vmem:[#allocation2 + $0x60] sm:$0xff] %v497_v8  ;;  %501 = vst [vmem:[#allocation2 + $0x68] sm:$0xff] %v500_v12  ;;  %v599_v28 = vor.u32 %v598_v3, %v409_v10  ;;  %v603_v10 = vor.u32 %v602_v27, %v423_v18 }
  0x2b   : > { %618 = vrot.lane.b32.xlu1 %v587_v57, %s3616_s27  ;;  %v493_v57 = vld [vmem:[#allocation2 + $0x58] sm:$0xff] }
  0x2c   : > { %v494_v1 = vsel %vm3789_vm4, %v407_v31, %v493_v57 }
  0x2d   : > { %527 = vrot.lane.b32.xlu0 %v235_v36, %s3615_s26  ;;  %v475_v36 = vld [vmem:[#allocation2 + $0x28] sm:$0xff]  ;;  %495 = vst [vmem:[#allocation2 + $0x58] sm:$0xff] %v494_v1 }
  0x2e   : > { %v476_v6 = vsel %vm3789_vm4, %v3747_v61, %v475_v36  ;;  %v488_v61 = vsel %vm3789_vm4, %v3775_v15, %v487_v44  ;;  %v3563_v36 = vld [vmem:[%s4990_s1 + $0x8] ss:$0 sps:$4 sm:$0xff]   ;;  %v3944_v44 = vld [vmem:[%s4990_s1 + $0x18] sm:$0xff]  }
  0x2f   : > { %620 = vrot.lane.b32.xlu1 %v589_v5, %s3616_s27  ;;  %v502_v5 = vld [vmem:[#allocation2 + $0x70] sm:$0xff]  ;;  %477 = vst [vmem:[#allocation2 + $0x28] sm:$0xff] %v476_v6  ;;  %489 = vst [vmem:[#allocation2 + $0x48] sm:$0xff] %v488_v61  ;;  %v967_v43 = vsel %vm789_vm1, %v3563_v36, 0 }
  0x30   : > { %v503_v15 = vsel %vm3789_vm4, %v428_v50, %v502_v5 }
  0x31   : > { %529 = vrot.lane.b32.xlu0 %v3726_v45, %s3615_s26  ;;  %504 = vst [vmem:[#allocation2 + $0x70] sm:$0xff] %v503_v15  ;;  %v597_v45 = vor.u32 %v596_v17, %v402_v7 }
  0x33   : > { %622 = vrot.lane.b32.xlu1 %v591_v11, %s3616_s27  ;;  %v440_v11 = vshll.u32 %v3772_v14, 16 }
  0x35   : > { %531 = vrot.lane.b32.xlu0 %v3734_v51, %s3615_s26  ;;  %v442_v25 = vor.u32 %v440_v11, %v439_v59  ;;  %v600_v51 = vrot.slane %v419_v32, 1  ;;  %v606_v29 = vrot.slane %v440_v11, 1 }
  0x37   : > { %624 = vrot.lane.b32.xlu1 %v3781_v19, %s3616_s27  ;;  %v508_v19 = vld [vmem:[#allocation2 + $0x80] sm:$0xff]  ;;  %v601_v7 = vor.u32 %v600_v51, %v416_v13  ;;  %v607_v13 = vor.u32 %v606_v29, %v437_v40 }
  0x38   : > { %v509_v21 = vsel %vm3789_vm4, %v442_v25, %v508_v19 }
  0x39   : > { %533 = vrot.lane.b32.xlu0 %v3741_v56, %s3615_s26  ;;  %510 = vst [vmem:[#allocation2 + $0x80] sm:$0xff] %v509_v21  ;;  %v604_v56 = vrot.slane %v433_v39, 1 }
  0x3b   : > { %626 = vrot.lane.b32.xlu1 %v595_v16, %s3616_s27 }
  0x3d   : > { %535 = vrot.lane.b32.xlu0 %v3745_v60, %s3615_s26  ;;  %v605_v60 = vor.u32 %v604_v56, %v430_v23 }
  0x3f   : > { %628 = vrot.lane.b32.xlu1 %v597_v45, %s3616_s27 }
  0x41   : > { %537 = vrot.lane.b32.xlu0 %v3752_v0, %s3615_s26 }
  0x43   : > { %630 = vrot.lane.b32.xlu1 %v599_v28, %s3616_s27 }
  0x45   : > { %539 = vrot.lane.b32.xlu0 %v3759_v4, %s3615_s26 }
  0x47   : > { %632 = vrot.lane.b32.xlu1 %v601_v7, %s3616_s27 }
  0x49   : > { %541 = vrot.lane.b32.xlu0 %v3772_v14, %s3615_s26 }
  0x4b   : > { %634 = vrot.lane.b32.xlu1 %v603_v10, %s3616_s27 }
  0x4d   : > { %636 = vrot.lane.b32.xlu0 %v605_v60, %s3616_s27 }
  0x4f   : > { %638 = vrot.lane.b32.xlu1 %v607_v13, %s3616_s27 }
  0x83   : > { %v512_v30 = vpop.permute.xlu0 %511  ;;  %v516_v0 = vpop.permute.xlu1 %515 }
  0x84   : > { %560 = vst.msk [vmem:[#allocation2 + $0x8] sm:$0xff] %vm559_vm5, %v512_v30  ;;  %562 = vst.msk [vmem:[#allocation2 + $0x18] sm:$0xff] %vm559_vm5, %v516_v0 }
  0x87   : > { %v514_v4 = vpop.permute.xlu0 %513 }
  0x88   : > { %561 = vst.msk [vmem:[#allocation2 + $0x10] sm:$0xff] %vm559_vm5, %v514_v4 }
  0x89   : > { %v609_v14 = vpop.permute.xlu1 %608 }
  0x8b   : > { %v659_v23 = vld [vmem:[#allocation2 + $0x8] sm:$0xff]  ;;  %v518_v31 = vpop.permute.xlu0 %517  ;;  %v665_v38 = vld [vmem:[#allocation2 + $0x18] sm:$0xff] }
  0x8c   : > { %v3914_v32 = vsel %vm3908_vm8, %v609_v14, %v659_v23  ;;  %563 = vst.msk [vmem:[#allocation2 + $0x20] sm:$0xff] %vm559_vm5, %v518_v31  ;;  %v707_v31 = vld [vmem:[#allocation2] sm:$0xff] }
  0x8d   : > { %661 = vst [vmem:[#allocation2 + $0x8] sm:$0xff] %v3914_v32  ;;  %v611_v33 = vpop.permute.xlu1 %610  ;;  %3187 = vmatprep.mubr.msk.bf16.mxu0 %vm199_vm0, %v3914_v32 }
  0x8f   : > { %v662_v34 = vld [vmem:[#allocation2 + $0x10] sm:$0xff]  ;;  %v520_v35 = vpop.permute.xlu0 %519 }
  0x90   : > { %v3925_v37 = vsel %vm3908_vm8, %v611_v33, %v662_v34  ;;  %564 = vst.msk [vmem:[#allocation2 + $0x28] sm:$0xff] %vm559_vm5, %v520_v35  ;;  %v3565_v33 = vld [vmem:[%s4990_s1 + $0x20] ss:$0 sps:$4 sm:$0xff]  }
  0x91   : > { %664 = vst [vmem:[#allocation2 + $0x10] sm:$0xff] %v3925_v37  ;;  %v613_v39 = vpop.permute.xlu1 %612  ;;  %3188 = vmatmul.mubr.msk.bf16.vlgmr.msra.gmra.mrb[0].mxu0 %vm199_vm0, %v3925_v37  ;;  %v1147_v34 = vsel %vm789_vm1, %v3565_v33, 0 }
  0x92   : > { %v3933_v40 = vsel %vm3908_vm8, %v613_v39, %v665_v38  ;;  %3220 = vmatpush3.bf16.msra.mxu0 %v3712_v20 }
  0x93   : > { %667 = vst [vmem:[#allocation2 + $0x18] sm:$0xff] %v3933_v40  ;;  %v522_v41 = vpop.permute.xlu0 %521  ;;  %v668_v42 = vld [vmem:[#allocation2 + $0x20] sm:$0xff]  ;;  %3191 = vmatprep.mubr.msk.bf16.mxu0 %vm199_vm0, %v3933_v40  ;;  %3528 = vmatprep.subr.msk.bf16.mxu0 %vm789_vm1, %v3563_v36 }
  0x94   : > { %565 = vst.msk [vmem:[#allocation2 + $0x30] sm:$0xff] %vm559_vm5, %v522_v41 }
  0x95   : > { %v615_v46 = vpop.permute.xlu1 %614 }
  0x96   : > { %v3949_v20 = vsel %vm3908_vm8, %v615_v46, %v668_v42  ;;  %3222 = vmatpush3.bf16.msra.mxu0 %v967_v43 }
  0x97   : > { %670 = vst [vmem:[#allocation2 + $0x20] sm:$0xff] %v3949_v20  ;;  %v524_v49 = vpop.permute.xlu0 %523  ;;  %v671_v50 = vld [vmem:[#allocation2 + $0x28] sm:$0xff]  ;;  %3255 = vmatprep.subr.bf16.mxu0 %v3944_v44 }
  0x98   : > { %566 = vst.msk [vmem:[#allocation2 + $0x38] sm:$0xff] %vm559_vm5, %v524_v49 }
  0x99   : > { %v617_v54 = vpop.permute.xlu1 %616  ;;  %3192 = vmatmul.mubr.msk.bf16.gmra.mrb[4].mxu0 %vm199_vm0, %v3949_v20 }
  0x9a   : > { %v3958_v55 = vsel %vm3908_vm8, %v617_v54, %v671_v50 }
  0x9b   : > { %673 = vst [vmem:[#allocation2 + $0x28] sm:$0xff] %v3958_v55  ;;  %v526_v57 = vpop.permute.xlu0 %525  ;;  %v674_v58 = vld [vmem:[#allocation2 + $0x30] sm:$0xff]  ;;  %3195 = vmatprep.mubr.msk.bf16.mxu0 %vm199_vm0, %v3958_v55 }
  0x9c   : > { %567 = vst.msk [vmem:[#allocation2 + $0x40] sm:$0xff] %vm559_vm5, %v526_v57 }
  0x9d   : > { %v619_v47 = vpop.permute.xlu1 %618 }
  0x9e   : > { %v3966_v59 = vsel %vm3908_vm8, %v619_v47, %v674_v58 }
  0x9f   : > { %676 = vst [vmem:[#allocation2 + $0x30] sm:$0xff] %v3966_v59  ;;  %v528_v63 = vpop.permute.xlu0 %527  ;;  %v677_v52 = vld [vmem:[#allocation2 + $0x38] sm:$0xff] }
  0xa0   : > { %568 = vst.msk [vmem:[#allocation2 + $0x48] sm:$0xff] %vm559_vm5, %v528_v63 }
  0xa1   : > { %v621_v2 = vpop.permute.xlu1 %620  ;;  %3196 = vmatmul.mubr.msk.bf16.gmra.mrb[8].mxu0 %vm199_vm0, %v3966_v59 }
  0xa2   : > { %v3974_v5 = vsel %vm3908_vm8, %v621_v2, %v677_v52 }
  0xa3   : > { %679 = vst [vmem:[#allocation2 + $0x38] sm:$0xff] %v3974_v5  ;;  %v530_v6 = vpop.permute.xlu0 %529  ;;  %v680_v9 = vld [vmem:[#allocation2 + $0x40] sm:$0xff]  ;;  %3199 = vmatprep.mubr.msk.bf16.mxu0 %vm199_vm0, %v3974_v5 }
  0xa4   : > { %569 = vst.msk [vmem:[#allocation2 + $0x50] sm:$0xff] %vm559_vm5, %v530_v6 }
  0xa5   : > { %v623_v48 = vpop.permute.xlu1 %622 }
  0xa6   : > { %v3982_v53 = vsel %vm3908_vm8, %v623_v48, %v680_v9 }
  0xa7   : > { %682 = vst [vmem:[#allocation2 + $0x40] sm:$0xff] %v3982_v53  ;;  %v532_v61 = vpop.permute.xlu0 %531  ;;  %v683_v62 = vld [vmem:[#allocation2 + $0x48] sm:$0xff] }
  0xa8   : > { %570 = vst.msk [vmem:[#allocation2 + $0x58] sm:$0xff] %vm559_vm5, %v532_v61 }
  0xa9   : > { %v625_v1 = vpop.permute.xlu1 %624  ;;  %3200 = vmatmul.mubr.msk.bf16.gmra.mrb[12].mxu0 %vm199_vm0, %v3982_v53 }
  0xaa   : > { %v3990_v8 = vsel %vm3908_vm8, %v625_v1, %v683_v62 }
  0xab   : > { %685 = vst [vmem:[#allocation2 + $0x48] sm:$0xff] %v3990_v8  ;;  %v534_v11 = vpop.permute.xlu0 %533  ;;  %v686_v12 = vld [vmem:[#allocation2 + $0x50] sm:$0xff]  ;;  %3203 = vmatprep.mubr.msk.bf16.mxu0 %vm199_vm0, %v3990_v8 }
  0xac   : > { %571 = vst.msk [vmem:[#allocation2 + $0x60] sm:$0xff] %vm559_vm5, %v534_v11 }
  0xad   : > { %v627_v15 = vpop.permute.xlu1 %626 }
  0xae   : > { %v3998_v16 = vsel %vm3908_vm8, %v627_v15, %v686_v12 }
  0xaf   : > { %688 = vst [vmem:[#allocation2 + $0x50] sm:$0xff] %v3998_v16  ;;  %v536_v17 = vpop.permute.xlu0 %535  ;;  %v689_v22 = vld [vmem:[#allocation2 + $0x58] sm:$0xff] }
  0xb0   : > { %572 = vst.msk [vmem:[#allocation2 + $0x68] sm:$0xff] %vm559_vm5, %v536_v17 }
  0xb1   : > { %v629_v25 = vpop.permute.xlu1 %628  ;;  %3204 = vmatmul.mubr.msk.bf16.gmra.mrb[16].mxu0 %vm199_vm0, %v3998_v16 }
  0xb2   : > { %v4006_v26 = vsel %vm3908_vm8, %v629_v25, %v689_v22 }
  0xb3   : > { %691 = vst [vmem:[#allocation2 + $0x58] sm:$0xff] %v4006_v26  ;;  %v538_v45 = vpop.permute.xlu0 %537  ;;  %v692_v3 = vld [vmem:[#allocation2 + $0x60] sm:$0xff]  ;;  %3207 = vmatprep.mubr.msk.bf16.mxu0 %vm199_vm0, %v4006_v26 }
  0xb4   : > { %573 = vst.msk [vmem:[#allocation2 + $0x70] sm:$0xff] %vm559_vm5, %v538_v45 }
  0xb5   : > { %v631_v19 = vpop.permute.xlu1 %630 }
  0xb6   : > { %v693_v21 = vsel %vm3908_vm8, %v631_v19, %v692_v3 }
  0xb7   : > { %694 = vst [vmem:[#allocation2 + $0x60] sm:$0xff] %v693_v21  ;;  %v540_v28 = vpop.permute.xlu0 %539  ;;  %v695_v51 = vld [vmem:[#allocation2 + $0x68] sm:$0xff] }
  0xb8   : > { %574 = vst.msk [vmem:[#allocation2 + $0x78] sm:$0xff] %vm559_vm5, %v540_v28 }
  0xb9   : > { %v633_v7 = vpop.permute.xlu1 %632  ;;  %3208 = vmatmul.mubr.msk.bf16.gmra.mrb[20].mxu0 %vm199_vm0, %v693_v21 }
  0xba   : > { %v696_v27 = vsel %vm3908_vm8, %v633_v7, %v695_v51 }
  0xbb   : > { %697 = vst [vmem:[#allocation2 + $0x68] sm:$0xff] %v696_v27  ;;  %v542_v56 = vpop.permute.xlu0 %541  ;;  %v698_v10 = vld [vmem:[#allocation2 + $0x70] sm:$0xff]  ;;  %3211 = vmatprep.mubr.msk.bf16.mxu0 %vm199_vm0, %v696_v27 }
  0xbc   : > { %575 = vst.msk [vmem:[#allocation2 + $0x80] sm:$0xff] %vm559_vm5, %v542_v56 }
  0xbd   : > { %v635_v29 = vpop.permute.xlu1 %634 }
  0xbe   : > { %v699_v60 = vsel %vm3908_vm8, %v635_v29, %v698_v10 }
  0xbf   : > { %700 = vst [vmem:[#allocation2 + $0x70] sm:$0xff] %v699_v60  ;;  %v701_v13 = vld [vmem:[#allocation2 + $0x78] sm:$0xff]  ;;  %v637_v30 = vpop.permute.xlu0 %636 }
  0xc0   : > { %v702_v0 = vsel %vm3908_vm8, %v637_v30, %v701_v13 }
  0xc1   : > { %703 = vst [vmem:[#allocation2 + $0x78] sm:$0xff] %v702_v0  ;;  %v639_v4 = vpop.permute.xlu1 %638  ;;  %3212 = vmatmul.mubr.msk.bf16.gmra.mrb[24].mxu0 %vm199_vm0, %v699_v60 }
  0xc2   : > { %3215 = vmatprep.mubr.msk.bf16.mxu0 %vm199_vm0, %v702_v0 }
  0xc3   : > { %v704_v14 = vld [vmem:[#allocation2 + $0x80] sm:$0xff] }
  0xc4   : > { %v705_v23 = vsel %vm3908_vm8, %v639_v4, %v704_v14 }
  0xc5   : > { %706 = vst [vmem:[#allocation2 + $0x80] sm:$0xff] %v705_v23 }
  0xc9   : > { %3216 = vmatmul.mubr.msk.bf16.gmra.mrb[28].mxu0 %vm199_vm0, %v705_v23 }
  0xca   : > { %3223 = vmatprep.mubr.msk.bf16.mxu0 %vm199_vm0, %v707_v31 }
  0xd1   : > { %3224 = vmatmul.mubr.msk.bf16.vlgmr.msra.gmra.mrb[0].mxu0 %vm199_vm0, %v3914_v32  ;;  %v724_v32 = vld [vmem:[#allocation2 + $0x88] sm:$0xff] }
  0xd2   : > { %3256 = vmatpush3.bf16.msra.mxu0 %v3944_v44  ;;  %3227 = vmatprep.mubr.msk.bf16.mxu0 %vm199_vm0, %v3925_v37 }
  0xd3   : > { %3529 = vmatprep.subr.msk.bf16.mxu0 %vm789_vm1, %v3565_v33 }
  0xd6   : > { %3258 = vmatpush3.bf16.msra.mxu0 %v1147_v34 }
  0xd9   : > { %3228 = vmatmul.mubr.msk.bf16.gmra.mrb[4].mxu0 %vm199_vm0, %v3933_v40 }
  0xda   : > { %3231 = vmatprep.mubr.msk.bf16.mxu0 %vm199_vm0, %v3949_v20 }
  0xe1   : > { %3232 = vmatmul.mubr.msk.bf16.gmra.mrb[8].mxu0 %vm199_vm0, %v3958_v55 }
  0xe2   : > { %3235 = vmatprep.mubr.msk.bf16.mxu0 %vm199_vm0, %v3966_v59 }
  0xe9   : > { %3236 = vmatmul.mubr.msk.bf16.gmra.mrb[12].mxu0 %vm199_vm0, %v3974_v5 }
  0xea   : > { %3239 = vmatprep.mubr.msk.bf16.mxu0 %vm199_vm0, %v3982_v53 }
  0xf1   : > { %3240 = vmatmul.mubr.msk.bf16.gmra.mrb[16].mxu0 %vm199_vm0, %v3990_v8 }
  0xf2   : > { %3243 = vmatprep.mubr.msk.bf16.mxu0 %vm199_vm0, %v3998_v16 }
  0xf9   : > { %3244 = vmatmul.mubr.msk.bf16.gmra.mrb[20].mxu0 %vm199_vm0, %v4006_v26 }
  0xfa   : > { %3247 = vmatprep.mubr.msk.bf16.mxu0 %vm199_vm0, %v693_v21 }
 0x101   : > { %3248 = vmatmul.mubr.msk.bf16.gmra.mrb[24].mxu0 %vm199_vm0, %v696_v27 }
 0x102   : > { %3251 = vmatprep.mubr.msk.bf16.mxu0 %vm199_vm0, %v699_v60 }
 0x109   : > { %3252 = vmatmul.mubr.msk.bf16.gmra.mrb[28].mxu0 %vm199_vm0, %v702_v0 }
 0x10a   : > { %3259 = vmatprep.mubr.msk.bf16.mxu0 %vm199_vm0, %v3925_v37 }
 0x111   : > { %3260 = vmatmul.mubr.msk.bf16.vlgmr.msra.gmra.mrb[0].mxu0 %vm199_vm0, %v3933_v40 }
 0x112   : > { %3263 = vmatprep.mubr.msk.bf16.mxu0 %vm199_vm0, %v3949_v20 }
 0x119   : > { %3264 = vmatmul.mubr.msk.bf16.gmra.mrb[4].mxu0 %vm199_vm0, %v3958_v55 }
 0x11a   : > { %3267 = vmatprep.mubr.msk.bf16.mxu0 %vm199_vm0, %v3966_v59 }
 0x121   : > { %3268 = vmatmul.mubr.msk.bf16.gmra.mrb[8].mxu0 %vm199_vm0, %v3974_v5 }
 0x122   : > { %3271 = vmatprep.mubr.msk.bf16.mxu0 %vm199_vm0, %v3982_v53 }
 0x129   : > { %3272 = vmatmul.mubr.msk.bf16.gmra.mrb[12].mxu0 %vm199_vm0, %v3990_v8 }
 0x12a   : > { %3275 = vmatprep.mubr.msk.bf16.mxu0 %vm199_vm0, %v3998_v16 }
 0x131   : > { %3276 = vmatmul.mubr.msk.bf16.gmra.mrb[16].mxu0 %vm199_vm0, %v4006_v26 }
 0x132   : > { %3279 = vmatprep.mubr.msk.bf16.mxu0 %vm199_vm0, %v693_v21 }
 0x139   : > { %3280 = vmatmul.mubr.msk.bf16.gmra.mrb[20].mxu0 %vm199_vm0, %v696_v27 }
 0x13a   : > { %3283 = vmatprep.mubr.msk.bf16.mxu0 %vm199_vm0, %v699_v60 }
 0x141   : > { %3284 = vmatmul.mubr.msk.bf16.gmra.mrb[24].mxu0 %vm199_vm0, %v702_v0 }
 0x142   : > { %3287 = vmatprep.mubr.msk.bf16.mxu0 %vm199_vm0, %v705_v23 }
 0x149   : > { %3288 = vmatmul.mubr.msk.bf16.gmra.mrb[28].mxu0 %vm199_vm0, %v724_v32 }
 0x1e4   : > { %v4088_v35 = vpop.f32.mrb[0].mxu0 }
 0x1e5   : > { %v4090_v36 = vpop.f32.mrb[1].mxu0  ;;  %v1414_v40 = vmul.f32 %v4088_v35, %v4088_v35  ;;  %v1346_v46 = vsel %vm460_vm2, %v4088_v35, 0.0 }
 0x1e6   : > { %v1412_v37 = vmul.f32 %v4090_v36, %v4090_v36  ;;  %v4094_v38 = vpop.f32.mrb[2].mxu0  ;;  %v1343_v41 = vsel %vm460_vm2, %v4090_v36, 0.0 }
 0x1e7   : > { %v4096_v39 = vpop.f32.mrb[3].mxu0  ;;  %v1415_v49 = vmul.f32 %v4094_v38, %v4094_v38  ;;  %v1447_v57 = vsel %vm460_vm2, %v1414_v40, 0.0  ;;  %v1348_v58 = vsel %vm460_vm2, %v4094_v38, 0.0 }
 0x1e8   : > { %v1344_v42 = vsel %vm460_vm2, %v4096_v39, 0.0  ;;  %v1413_v43 = vmul.f32 %v4096_v39, %v4096_v39  ;;  %v1444_v20 = vsel %vm460_vm2, %v1412_v37, 0.0 }
 0x1e9   : > { %v1345_v44 = vadd.f32 %v1344_v42, %v1343_v41  ;;  %v1449_v2 = vsel %vm460_vm2, %v1415_v49, 0.0 }
 0x1ea   : > { %v1445_v50 = vsel %vm460_vm2, %v1413_v43, 0.0 }
 0x1eb   : > { %v1347_v54 = vadd.f32 %v1346_v46, %v1345_v44  ;;  %v1446_v55 = vadd.f32 %v1445_v50, %v1444_v20 }
 0x1ec   : > { %v4115_v47 = vpop.f32.mrb[4].mxu0 }
 0x1ed   : > { %v1448_v59 = vadd.f32 %v1447_v57, %v1446_v55  ;;  %v4117_v63 = vpop.f32.mrb[5].mxu0  ;;  %v1349_v52 = vadd.f32 %v1348_v58, %v1347_v54  ;;  %v1418_v62 = vmul.f32 %v4115_v47, %v4115_v47  ;;  %v1354_v16 = vsel %vm460_vm2, %v4115_v47, 0.0 }
 0x1ee   : > { %v1350_v5 = vsel %vm460_vm2, %v4117_v63, 0.0  ;;  %v1416_v6 = vmul.f32 %v4117_v63, %v4117_v63  ;;  %v4124_v9 = vpop.f32.mrb[6].mxu0 }
 0x1ef   : > { %v1351_v48 = vadd.f32 %v1350_v5, %v1349_v52  ;;  %v1450_v53 = vadd.f32 %v1449_v2, %v1448_v59  ;;  %v4126_v61 = vpop.f32.mrb[7].mxu0  ;;  %v1419_v17 = vmul.f32 %v4124_v9, %v4124_v9  ;;  %v1455_v45 = vsel %vm460_vm2, %v1418_v62, 0.0 }
 0x1f0   : > { %v1451_v1 = vsel %vm460_vm2, %v1416_v6, 0.0  ;;  %v1352_v8 = vsel %vm460_vm2, %v4126_v61, 0.0  ;;  %v1417_v11 = vmul.f32 %v4126_v61, %v4126_v61  ;;  %v1356_v3 = vsel %vm460_vm2, %v4124_v9, 0.0 }
 0x1f1   : > { %v1452_v12 = vadd.f32 %v1451_v1, %v1450_v53  ;;  %v1353_v15 = vadd.f32 %v1352_v8, %v1351_v48  ;;  %v1457_v7 = vsel %vm460_vm2, %v1419_v17, 0.0 }
 0x1f2   : > { %v1453_v22 = vsel %vm460_vm2, %v1417_v11, 0.0 }
 0x1f3   : > { %v1355_v25 = vadd.f32 %v1354_v16, %v1353_v15  ;;  %v1454_v26 = vadd.f32 %v1453_v22, %v1452_v12 }
 0x1f4   : > { %v4143_v19 = vpop.f32.mrb[8].mxu0 }
 0x1f5   : > { %v1456_v21 = vadd.f32 %v1455_v45, %v1454_v26  ;;  %v4145_v28 = vpop.f32.mrb[9].mxu0  ;;  %v1357_v51 = vadd.f32 %v1356_v3, %v1355_v25  ;;  %v1422_v30 = vmul.f32 %v4143_v19, %v4143_v19  ;;  %v1362_v33 = vsel %vm460_vm2, %v4143_v19, 0.0 }
 0x1f6   : > { %v1358_v27 = vsel %vm460_vm2, %v4145_v28, 0.0  ;;  %v1420_v56 = vmul.f32 %v4145_v28, %v4145_v28  ;;  %v4152_v10 = vpop.f32.mrb[10].mxu0 }
 0x1f7   : > { %v1359_v29 = vadd.f32 %v1358_v27, %v1357_v51  ;;  %v1458_v60 = vadd.f32 %v1457_v7, %v1456_v21  ;;  %v4154_v13 = vpop.f32.mrb[11].mxu0  ;;  %v1423_v34 = vmul.f32 %v4152_v10, %v4152_v10  ;;  %v1463_v41 = vsel %vm460_vm2, %v1422_v30, 0.0 }
 0x1f8   : > { %v1459_v0 = vsel %vm460_vm2, %v1420_v56, 0.0  ;;  %v1360_v4 = vsel %vm460_vm2, %v4154_v13, 0.0  ;;  %v1421_v14 = vmul.f32 %v4154_v13, %v4154_v13  ;;  %v1364_v42 = vsel %vm460_vm2, %v4152_v10, 0.0 }
 0x1f9   : > { %v1460_v23 = vadd.f32 %v1459_v0, %v1458_v60  ;;  %v1361_v31 = vadd.f32 %v1360_v4, %v1359_v29  ;;  %v1465_v49 = vsel %vm460_vm2, %v1423_v34, 0.0 }
 0x1fa   : > { %v1461_v32 = vsel %vm460_vm2, %v1421_v14, 0.0 }
 0x1fb   : > { %v1363_v37 = vadd.f32 %v1362_v33, %v1361_v31  ;;  %v1462_v40 = vadd.f32 %v1461_v32, %v1460_v23 }
 0x1fc   : > { %v4171_v43 = vpop.f32.mrb[12].mxu0 }
 0x1fd   : > { %v1464_v44 = vadd.f32 %v1463_v41, %v1462_v40  ;;  %v4173_v46 = vpop.f32.mrb[13].mxu0  ;;  %v1365_v20 = vadd.f32 %v1364_v42, %v1363_v37  ;;  %v1426_v52 = vmul.f32 %v4171_v43, %v4171_v43  ;;  %v1370_v62 = vsel %vm460_vm2, %v4171_v43, 0.0 }
 0x1fe   : > { %v1366_v50 = vsel %vm460_vm2, %v4173_v46, 0.0  ;;  %v1424_v54 = vmul.f32 %v4173_v46, %v4173_v46  ;;  %v4180_v55 = vpop.f32.mrb[14].mxu0 }
 0x1ff   : > { %v1367_v57 = vadd.f32 %v1366_v50, %v1365_v20  ;;  %v1466_v58 = vadd.f32 %v1465_v49, %v1464_v44  ;;  %v4182_v59 = vpop.f32.mrb[15].mxu0  ;;  %v1427_v1 = vmul.f32 %v4180_v55, %v4180_v55  ;;  %v1471_v15 = vsel %vm460_vm2, %v1426_v52, 0.0 }
 0x200   : > { %v1467_v2 = vsel %vm460_vm2, %v1424_v54, 0.0  ;;  %v1368_v5 = vsel %vm460_vm2, %v4182_v59, 0.0  ;;  %v1425_v6 = vmul.f32 %v4182_v59, %v4182_v59  ;;  %v1372_v16 = vsel %vm460_vm2, %v4180_v55, 0.0 }
 0x201   : > { %v1468_v48 = vadd.f32 %v1467_v2, %v1466_v58  ;;  %v1369_v53 = vadd.f32 %v1368_v5, %v1367_v57  ;;  %v1473_v45 = vsel %vm460_vm2, %v1427_v1, 0.0 }
 0x202   : > { %v1469_v8 = vsel %vm460_vm2, %v1425_v6, 0.0 }
 0x203   : > { %v1371_v11 = vadd.f32 %v1370_v62, %v1369_v53  ;;  %v1470_v12 = vadd.f32 %v1469_v8, %v1468_v48 }
 0x204   : > { %v4199_v17 = vpop.f32.mrb[16].mxu0 }
 0x205   : > { %v1472_v22 = vadd.f32 %v1471_v15, %v1470_v12  ;;  %v4201_v25 = vpop.f32.mrb[17].mxu0  ;;  %v1373_v26 = vadd.f32 %v1372_v16, %v1371_v11  ;;  %v1430_v29 = vmul.f32 %v4199_v17, %v4199_v17  ;;  %v1378_v23 = vsel %vm460_vm2, %v4199_v17, 0.0 }
 0x206   : > { %v1374_v3 = vsel %vm460_vm2, %v4201_v25, 0.0  ;;  %v1428_v21 = vmul.f32 %v4201_v25, %v4201_v25  ;;  %v4208_v51 = vpop.f32.mrb[18].mxu0 }
 0x207   : > { %v1375_v7 = vadd.f32 %v1374_v3, %v1373_v26  ;;  %v1474_v27 = vadd.f32 %v1473_v45, %v1472_v22  ;;  %v4210_v56 = vpop.f32.mrb[19].mxu0  ;;  %v1431_v31 = vmul.f32 %v4208_v51, %v4208_v51  ;;  %v1479_v37 = vsel %vm460_vm2, %v1430_v29, 0.0 }
 0x208   : > { %v1475_v60 = vsel %vm460_vm2, %v1428_v21, 0.0  ;;  %v1376_v30 = vsel %vm460_vm2, %v4210_v56, 0.0  ;;  %v1429_v0 = vmul.f32 %v4210_v56, %v4210_v56  ;;  %v1380_v40 = vsel %vm460_vm2, %v4208_v51, 0.0 }
 0x209   : > { %v1476_v4 = vadd.f32 %v1475_v60, %v1474_v27  ;;  %v1377_v14 = vadd.f32 %v1376_v30, %v1375_v7  ;;  %v1481_v49 = vsel %vm460_vm2, %v1431_v31, 0.0 }
 0x20a   : > { %v1477_v33 = vsel %vm460_vm2, %v1429_v0, 0.0 }
 0x20b   : > { %v1379_v34 = vadd.f32 %v1378_v23, %v1377_v14  ;;  %v1478_v32 = vadd.f32 %v1477_v33, %v1476_v4 }
 0x20c   : > { %v4227_v41 = vpop.f32.mrb[20].mxu0 }
 0x20d   : > { %v1480_v42 = vadd.f32 %v1479_v37, %v1478_v32  ;;  %v4229_v44 = vpop.f32.mrb[21].mxu0  ;;  %v1381_v20 = vadd.f32 %v1380_v40, %v1379_v34  ;;  %v1434_v5 = vmul.f32 %v4227_v41, %v4227_v41  ;;  %v1386_v8 = vsel %vm460_vm2, %v4227_v41, 0.0 }
 0x20e   : > { %v1382_v50 = vsel %vm460_vm2, %v4229_v44, 0.0  ;;  %v1432_v54 = vmul.f32 %v4229_v44, %v4229_v44  ;;  %v4236_v57 = vpop.f32.mrb[22].mxu0 }
 0x20f   : > { %v1383_v58 = vadd.f32 %v1382_v50, %v1381_v20  ;;  %v1482_v52 = vadd.f32 %v1481_v49, %v1480_v42  ;;  %v4238_v2 = vpop.f32.mrb[23].mxu0  ;;  %v1435_v11 = vmul.f32 %v4236_v57, %v4236_v57  ;;  %v1487_v22 = vsel %vm460_vm2, %v1434_v5, 0.0 }
 0x210   : > { %v1483_v6 = vsel %vm460_vm2, %v1432_v54, 0.0  ;;  %v1384_v48 = vsel %vm460_vm2, %v4238_v2, 0.0  ;;  %v1433_v53 = vmul.f32 %v4238_v2, %v4238_v2  ;;  %v1388_v26 = vsel %vm460_vm2, %v4236_v57, 0.0 }
 0x211   : > { %v1484_v62 = vadd.f32 %v1483_v6, %v1482_v52  ;;  %v1385_v1 = vadd.f32 %v1384_v48, %v1383_v58  ;;  %v1489_v27 = vsel %vm460_vm2, %v1435_v11, 0.0 }
 0x212   : > { %v1485_v12 = vsel %vm460_vm2, %v1433_v53, 0.0 }
 0x213   : > { %v1387_v15 = vadd.f32 %v1386_v8, %v1385_v1  ;;  %v1486_v16 = vadd.f32 %v1485_v12, %v1484_v62 }
 0x214   : > { %v4255_v45 = vpop.f32.mrb[24].mxu0 }
 0x215   : > { %v1488_v3 = vadd.f32 %v1487_v22, %v1486_v16  ;;  %v4257_v21 = vpop.f32.mrb[25].mxu0  ;;  %v1389_v7 = vadd.f32 %v1388_v26, %v1387_v15  ;;  %v1438_v23 = vmul.f32 %v4255_v45, %v4255_v45  ;;  %v1394_v40 = vsel %vm460_vm2, %v4255_v45, 0.0 }
 0x216   : > { %v1390_v29 = vsel %vm460_vm2, %v4257_v21, 0.0  ;;  %v1436_v60 = vmul.f32 %v4257_v21, %v4257_v21  ;;  %v4264_v30 = vpop.f32.mrb[26].mxu0 }
 0x217   : > { %v1391_v0 = vadd.f32 %v1390_v29, %v1389_v7  ;;  %v1490_v4 = vadd.f32 %v1489_v27, %v1488_v3  ;;  %v4266_v14 = vpop.f32.mrb[27].mxu0  ;;  %v1439_v42 = vmul.f32 %v4264_v30, %v4264_v30  ;;  %v1495_v54 = vsel %vm460_vm2, %v1438_v23, 0.0 }
 0x218   : > { %v1491_v31 = vsel %vm460_vm2, %v1436_v60, 0.0  ;;  %v1392_v33 = vsel %vm460_vm2, %v4266_v14, 0.0  ;;  %v1437_v34 = vmul.f32 %v4266_v14, %v4266_v14  ;;  %v1396_v58 = vsel %vm460_vm2, %v4264_v30, 0.0 }
 0x219   : > { %v1492_v32 = vadd.f32 %v1491_v31, %v1490_v4  ;;  %v1393_v37 = vadd.f32 %v1392_v33, %v1391_v0  ;;  %v1497_v53 = vsel %vm460_vm2, %v1439_v42, 0.0 }
 0x21a   : > { %v1493_v20 = vsel %vm460_vm2, %v1437_v34, 0.0 }
 0x21b   : > { %v1395_v49 = vadd.f32 %v1394_v40, %v1393_v37  ;;  %v1494_v50 = vadd.f32 %v1493_v20, %v1492_v32 }
 0x21c   : > { %v4283_v52 = vpop.f32.mrb[28].mxu0 }
 0x21d   : > { %v1496_v5 = vadd.f32 %v1495_v54, %v1494_v50  ;;  %v4285_v6 = vpop.f32.mrb[29].mxu0  ;;  %v1397_v48 = vadd.f32 %v1396_v58, %v1395_v49  ;;  %v1442_v16 = vmul.f32 %v4283_v52, %v4283_v52  ;;  %v1402_v29 = vsel %vm460_vm2, %v4283_v52, 0.0 }
 0x21e   : > { %v1398_v62 = vsel %vm460_vm2, %v4285_v6, 0.0  ;;  %v1440_v1 = vmul.f32 %v4285_v6, %v4285_v6  ;;  %v4292_v8 = vpop.f32.mrb[30].mxu0 }
 0x21f   : > { %v1399_v11 = vadd.f32 %v1398_v62, %v1397_v48  ;;  %v1498_v12 = vadd.f32 %v1497_v53, %v1496_v5  ;;  %v1298_v15 = vpop.f32.mrb[31].mxu0  ;;  %v1443_v60 = vmul.f32 %v4292_v8, %v4292_v8  ;;  %v1503_v31 = vsel %vm460_vm2, %v1442_v16, 0.0 }
 0x220   : > { %v1499_v22 = vsel %vm460_vm2, %v1440_v1, 0.0  ;;  %v1400_v26 = vsel %vm460_vm2, %v1298_v15, 0.0  ;;  %v1441_v3 = vmul.f32 %v1298_v15, %v1298_v15  ;;  %v1404_v33 = vsel %vm460_vm2, %v4292_v8, 0.0 }
 0x221   : > { %v1500_v7 = vadd.f32 %v1499_v22, %v1498_v12  ;;  %v1401_v27 = vadd.f32 %v1400_v26, %v1399_v11  ;;  %v1505_v37 = vsel %vm460_vm2, %v1443_v60, 0.0 }
 0x222   : > { %v1501_v0 = vsel %vm460_vm2, %v1441_v3, 0.0 }
 0x223   : > { %v1403_v4 = vadd.f32 %v1402_v29, %v1401_v27  ;;  %v1502_v23 = vadd.f32 %v1501_v0, %v1500_v7  ;;  %v1525_v7 = vlaneseq  ;;  %v4310_v27 = vld [vmem:[%s4992_s3] sm:$0xff] }
 0x224   : > { %v1529_v0 = vrot.slane %v4310_v27, 2 }
 0x225   : > { %v1405_v34 = vadd.f32 %v1404_v33, %v1403_v4  ;;  %v1504_v32 = vadd.f32 %v1503_v31, %v1502_v23  ;;  %v1526_v29 = vand.u32 127, %v1525_v7  ;;  %v4312_v60 = vshrl.u32 %v1525_v7, 7 }
 0x227   : > { %v1406_v40 = vrot.slane %v1405_v34, 4  ;;  %v1506_v42 = vadd.f32 %v1505_v37, %v1504_v32  ;;  %vm1527_vm9 = vcmp.lt.s32.totalorder %v1526_v29, 4  ;;  %v1535_v23 = vsub.s32 0, %v4312_v60 }
 0x229   : > { %v1407_v20 = vadd.f32 %v1406_v40, %v1405_v34  ;;  %v1507_v49 = vrot.slane %v1506_v42, 4  ;;  %v1571_v40 = vsub.s32 1, %v4312_v60 }
 0x22b   : > { %v1408_v50 = vrot.slane %v1407_v20, 2  ;;  %v1508_v54 = vadd.f32 %v1507_v49, %v1506_v42 }
 0x22d   : > { %v1409_v58 = vadd.f32 %v1408_v50, %v1407_v20  ;;  %v1509_v5 = vrot.slane %v1508_v54, 2 }
 0x22f   : > { %v1410_v48 = vrot.slane %v1409_v58, 1  ;;  %v1510_v53 = vadd.f32 %v1509_v5, %v1508_v54 }
 0x231   : > { %v1411_v62 = vadd.f32 %v1410_v48, %v1409_v58  ;;  %v1511_v1 = vrot.slane %v1510_v53, 1 }
 0x233   : > { %v1512_v11 = vadd.f32 %v1511_v1, %v1510_v53  ;;  %v1513_v12 = vmul.f32 0.00390625, %v1411_v62 }
 0x235   : > { %v1514_v16 = vmul.f32 0.00390625, %v1512_v11  ;;  %v1515_v22 = vmul.f32 %v1513_v12, %v1513_v12 }
 0x237   : > { %v1516_v26 = vsub.f32 %v1514_v16, %v1515_v22 }
 0x239   : > { %v1517_v3 = vadd.f32 1e-05, %v1516_v26 }
 0x23b   : > { %3588 = vrsqrt.f32 %v1517_v3 }
 0x245   : > { %v3589_v4 = vpop.eup %3588 }
 0x246   : > { %v1519_v31 = vmul.f32 %v3589_v4, %v4310_v27 }
 0x248   : > { %v1520_v33 = vmul.f32 %v1519_v31, %v1513_v12  ;;  %v1531_v34 = vsel %vm1527_vm9, %v1519_v31, %v1529_v0 }
 0x249   : > { %v1536_v32 = vrot.slane %v1531_v34, %v1535_v23 }
 0x24a   : > { %v1522_v37 = vrot.slane %v1520_v33, 7 }
 0x24b   : > { %v1566_v42 = vmul.f32 %v1536_v32, %v1298_v15  ;;  %v1537_v20 = vmul.f32 %v1536_v32, %v4090_v36  ;;  %v1538_v49 = vmul.f32 %v1536_v32, %v4096_v39  ;;  %v1539_v50 = vmul.f32 %v4088_v35, %v1536_v32 }
 0x24c   : > { %v1524_v54 = vsub.f32 %v4310_v27, %v1522_v37  ;;  %v1540_v58 = vmul.f32 %v4094_v38, %v1536_v32  ;;  %v1541_v5 = vmul.f32 %v1536_v32, %v4117_v63  ;;  %v1542_v48 = vmul.f32 %v1536_v32, %v4126_v61 }
 0x24d   : > { %v1543_v53 = vmul.f32 %v4115_v47, %v1536_v32  ;;  %v1544_v62 = vmul.f32 %v4124_v9, %v1536_v32  ;;  %v1545_v15 = vmul.f32 %v1536_v32, %v4145_v28  ;;  %v1546_v36 = vmul.f32 %v1536_v32, %v4154_v13 }
 0x24e   : > { %v1532_v39 = vsel %vm1527_vm9, %v1524_v54, %v1529_v0  ;;  %v1547_v35 = vmul.f32 %v4143_v19, %v1536_v32  ;;  %v1548_v1 = vmul.f32 %v4152_v10, %v1536_v32  ;;  %v1549_v38 = vmul.f32 %v1536_v32, %v4173_v46 }
 0x24f   : > { %v1572_v11 = vrot.slane %v1532_v39, %v1571_v40  ;;  %v1550_v63 = vmul.f32 %v1536_v32, %v4182_v59  ;;  %v1551_v61 = vmul.f32 %v4171_v43, %v1536_v32  ;;  %v1552_v47 = vmul.f32 %v4180_v55, %v1536_v32 }
 0x250   : > { %v1553_v9 = vmul.f32 %v1536_v32, %v4201_v25  ;;  %v1554_v28 = vmul.f32 %v1536_v32, %v4210_v56  ;;  %v1555_v13 = vmul.f32 %v4199_v17, %v1536_v32  ;;  %v1556_v12 = vmul.f32 %v4208_v51, %v1536_v32 }
 0x251   : > { %v4341_v19 = vadd.f32 %v1572_v11, %v1566_v42  ;;  %v1557_v10 = vmul.f32 %v1536_v32, %v4229_v44  ;;  %v1558_v46 = vmul.f32 %v1536_v32, %v4238_v2  ;;  %v1559_v59 = vmul.f32 %v4227_v41, %v1536_v32 }
 0x252   : > { %v1560_v43 = vmul.f32 %v4236_v57, %v1536_v32  ;;  %v1561_v55 = vmul.f32 %v1536_v32, %v4257_v21  ;;  %v1562_v25 = vmul.f32 %v1536_v32, %v4266_v14  ;;  %v1563_v56 = vmul.f32 %v4255_v45, %v1536_v32 }
 0x253   : > { %v1564_v17 = vmul.f32 %v4264_v30, %v1536_v32  ;;  %v1565_v51 = vmul.f32 %v1536_v32, %v4285_v6  ;;  %v1567_v16 = vmul.f32 %v4283_v52, %v1536_v32  ;;  %v1568_v44 = vmul.f32 %v4292_v8, %v1536_v32 }
 0x254   : > { %v1575_v22 = vadd.f32 %v1572_v11, %v1539_v50  ;;  %v1576_v2 = vadd.f32 %v1572_v11, %v1540_v58  ;;  %v1573_v26 = vadd.f32 %v1572_v11, %v1537_v20  ;;  %v1574_v41 = vadd.f32 %v1572_v11, %v1538_v49 }
 0x255   : > { %v1577_v3 = vadd.f32 %v1572_v11, %v1541_v5  ;;  %v1578_v57 = vadd.f32 %v1572_v11, %v1542_v48  ;;  %v1579_v7 = vadd.f32 %v1572_v11, %v1543_v53  ;;  %v1580_v14 = vadd.f32 %v1572_v11, %v1544_v62 }
 0x256   : > { %v1607_v21 = vmax.f32 %v1575_v22, 0.0  ;;  %v1608_v29 = vmax.f32 %v1576_v2, 0.0  ;;  %v1581_v0 = vadd.f32 %v1572_v11, %v1545_v15  ;;  %v1582_v45 = vadd.f32 %v1572_v11, %v1546_v36 }
 0x257   : > { %v1583_v4 = vadd.f32 %v1572_v11, %v1547_v35  ;;  %v1584_v30 = vadd.f32 %v1572_v11, %v1548_v1  ;;  %v1585_v23 = vadd.f32 %v1572_v11, %v1549_v38  ;;  %v1586_v52 = vadd.f32 %v1572_v11, %v1550_v63 }
 0x258   : > { %v4354_v6 = vpack.c.bf16 %v1608_v29, %v1607_v21  ;;  %v4356_v31 = vadd.f32 %v1572_v11, %v1551_v61  ;;  %v4358_v8 = vadd.f32 %v1572_v11, %v1552_v47  ;;  %v4360_v33 = vadd.f32 %v1572_v11, %v1553_v9 }
 0x259   : > { %v4362_v34 = vadd.f32 %v1572_v11, %v1554_v28  ;;  %v4364_v32 = vadd.f32 %v1572_v11, %v1555_v13  ;;  %v4366_v37 = vadd.f32 %v1572_v11, %v1556_v12  ;;  %v4370_v40 = vadd.f32 %v1572_v11, %v1557_v10  ;;  %v3566_v13 = vld [vmem:[%s4991_s2 + $0xc] sm:$0xff]  }
 0x25a   : > { %1847 = vrot.lane.b32.xlu1 %v4354_v6, %s3615_s26  ;;  %v4372_v42 = vadd.f32 %v1572_v11, %v1558_v46  ;;  %v4374_v20 = vadd.f32 %v1572_v11, %v1559_v59  ;;  %v4376_v49 = vadd.f32 %v1572_v11, %v1560_v43  ;;  %v4378_v50 = vadd.f32 %v1572_v11, %v1561_v55 }
 0x25b   : > { %v4380_v54 = vadd.f32 %v1572_v11, %v1562_v25  ;;  %v4382_v58 = vadd.f32 %v1572_v11, %v1563_v56  ;;  %v4384_v5 = vadd.f32 %v1572_v11, %v1564_v17  ;;  %v4386_v48 = vadd.f32 %v1572_v11, %v1565_v51  ;;  %3291 = vmatprep.subr.bf16.mxu1 %v3566_v13  ;;  %v4405_v17 = vld [vmem:[%s4991_s2 + $0x14] ss:$0 sps:$4 sm:$0xff]  }
 0x25c   : > { %v4388_v53 = vadd.f32 %v1572_v11, %v1567_v16  ;;  %v4390_v62 = vadd.f32 %v1572_v11, %v1568_v44  ;;  %v1605_v15 = vmax.f32 %v1573_v26, 0.0  ;;  %v1606_v36 = vmax.f32 %v1574_v41, 0.0  ;;  %3292 = vmatpush3.bf16.msra.mxu1 %v3566_v13 }
 0x25d   : > { %v1609_v39 = vmax.f32 %v1577_v3, 0.0  ;;  %v1610_v35 = vmax.f32 %v1578_v57, 0.0  ;;  %v1611_v1 = vmax.f32 %v1579_v7, 0.0  ;;  %v1612_v38 = vmax.f32 %v1580_v14, 0.0  ;;  %3530 = vmatprep.subr.msk.bf16.mxu1 %vm789_vm1, %v4405_v17 }
 0x25e   : > { %v1613_v63 = vmax.f32 %v1581_v0, 0.0  ;;  %v1637_v61 = vpack.c.bf16 %v1606_v36, %v1605_v15  ;;  %v1614_v9 = vmax.f32 %v1582_v45, 0.0  ;;  %v1615_v28 = vmax.f32 %v1583_v4, 0.0 }
 0x25f   : > { %v1639_v47 = vpack.c.bf16 %v1610_v35, %v1609_v39  ;;  %v1640_v12 = vpack.c.bf16 %v1612_v38, %v1611_v1  ;;  %v1664_v10 = vshll.u32 %v4354_v6, 16  ;;  %v1616_v11 = vmax.f32 %v1584_v30, 0.0 }
 0x260   : > { %1845 = vrot.lane.b32.xlu0 %v1637_v61, %s3615_s26  ;;  %v1657_v46 = vshll.u32 %v1637_v61, 16  ;;  %v4397_v59 = vpack.c.bf16 %v1614_v9, %v1613_v63  ;;  %v1654_v55 = vshrl.u32 %v1637_v61, 16  ;;  %v1661_v56 = vshrl.u32 %v4354_v6, 16 }
 0x261   : > { %v4399_v43 = vpack.c.bf16 %v1616_v11, %v1615_v28  ;;  %v1911_v51 = vrot.slane %v1664_v10, 1  ;;  %v1671_v16 = vshll.u32 %v1639_v47, 16  ;;  %v1617_v44 = vmax.f32 %v1585_v23, 0.0 }
 0x262   : > { %v1909_v25 = vrot.slane %v1657_v46, 1  ;;  %v1618_v22 = vmax.f32 %v1586_v52, 0.0  ;;  %v1668_v26 = vshrl.u32 %v1639_v47, 16  ;;  %v1675_v41 = vshrl.u32 %v1640_v12, 16 }
 0x263   : > { %v1678_v57 = vshll.u32 %v1640_v12, 16  ;;  %v1619_v7 = vmax.f32 %v4356_v31, 0.0  ;;  %v1620_v21 = vmax.f32 %v4358_v8, 0.0  ;;  %v1656_v29 = vrot.slane %v1654_v55, 7 }
 0x264   : > { %1849 = vrot.lane.b32.xlu0 %v1639_v47, %s3615_s26  ;;  %v1910_v2 = vor.u32 %v1909_v25, %v1654_v55  ;;  %v4410_v3 = vpack.c.bf16 %v1618_v22, %v1617_v44  ;;  %v1663_v14 = vrot.slane %v1661_v56, 7  ;;  %v1912_v0 = vor.u32 %v1911_v51, %v1661_v56 }
 0x265   : > { %v1913_v45 = vrot.slane %v1671_v16, 1  ;;  %v1682_v4 = vshrl.u32 %v4397_v59, 16  ;;  %v4417_v30 = vpack.c.bf16 %v1620_v21, %v1619_v7  ;;  %v1621_v23 = vmax.f32 %v4360_v33, 0.0 }
 0x266   : > { %1941 = vrot.lane.b32.xlu1 %v1910_v2, %s3616_s27  ;;  %v1622_v6 = vmax.f32 %v4362_v34, 0.0  ;;  %v1634_v52 = vmax.f32 %v4341_v19, 0.0  ;;  %v1670_v15 = vrot.slane %v1668_v26, 7  ;;  %v1677_v31 = vrot.slane %v1675_v41, 7 }
 0x267   : > { %v1915_v8 = vrot.slane %v1678_v57, 1  ;;  %v1685_v36 = vshll.u32 %v4397_v59, 16  ;;  %v1623_v35 = vmax.f32 %v4364_v32, 0.0  ;;  %v4427_v1 = vor.u32 %v1657_v46, %v1656_v29 }
 0x268   : > { %1851 = vrot.lane.b32.xlu0 %v1640_v12, %s3615_s26  ;;  %v4424_v39 = vpack.c.bf16 %v1622_v6, %v1621_v23  ;;  %v4429_v38 = vor.u32 %v1664_v10, %v1663_v14  ;;  %v1914_v33 = vor.u32 %v1913_v45, %v1668_v26  ;;  %v1624_v34 = vmax.f32 %v4366_v37, 0.0 }
 0x269   : > { %v1684_v63 = vrot.slane %v1682_v4, 7  ;;  %v1689_v61 = vshrl.u32 %v4399_v43, 16  ;;  %v1692_v47 = vshll.u32 %v4399_v43, 16  ;;  %v1625_v9 = vmax.f32 %v4370_v40, 0.0 }
 0x26a   : > { %1943 = vrot.lane.b32.xlu1 %v1912_v0, %s3616_s27  ;;  %v1696_v28 = vshrl.u32 %v4410_v3, 16  ;;  %v1699_v32 = vshll.u32 %v4410_v3, 16  ;;  %v4439_v13 = vpack.c.bf16 %v1624_v34, %v1623_v35  ;;  %v1626_v12 = vmax.f32 %v4372_v42, 0.0 }
 0x26b   : > { %v4442_v10 = vor.u32 %v1671_v16, %v1670_v15  ;;  %v4445_v37 = vor.u32 %v1678_v57, %v1677_v31  ;;  %v1916_v11 = vor.u32 %v1915_v8, %v1675_v41  ;;  %v1917_v46 = vrot.slane %v1685_v36, 1 }
 0x26c   : > { %1853 = vrot.lane.b32.xlu0 %v4397_v59, %s3615_s26  ;;  %v1703_v59 = vshrl.u32 %v4417_v30, 16  ;;  %v4448_v55 = vpack.c.bf16 %v1626_v12, %v1625_v9  ;;  %v1627_v40 = vmax.f32 %v4374_v20, 0.0  ;;  %v1628_v25 = vmax.f32 %v4376_v49, 0.0 }
 0x26d   : > { %v4454_v42 = vor.u32 %v1685_v36, %v1684_v63  ;;  %v1691_v56 = vrot.slane %v1689_v61, 7  ;;  %v1919_v51 = vrot.slane %v1692_v47, 1  ;;  %v1710_v16 = vshrl.u32 %v4424_v39, 16 }
 0x26e   : > { %1945 = vrot.lane.b32.xlu1 %v1914_v33, %s3616_s27  ;;  %v1698_v44 = vrot.slane %v1696_v28, 7  ;;  %v1921_v22 = vrot.slane %v1699_v32, 1  ;;  %v4457_v2 = vpack.c.bf16 %v1628_v25, %v1627_v40  ;;  %v1629_v26 = vmax.f32 %v4378_v50, 0.0 }
 0x26f   : > { %v1918_v20 = vor.u32 %v1917_v46, %v1682_v4  ;;  %v1706_v49 = vshll.u32 %v4417_v30, 16  ;;  %v1717_v41 = vshrl.u32 %v4439_v13, 16  ;;  %v1705_v57 = vrot.slane %v1703_v59, 7 }
 0x270   : > { %1855 = vrot.lane.b32.xlu0 %v4399_v43, %s3615_s26  ;;  %v1630_v43 = vmax.f32 %v4380_v54, 0.0  ;;  %v1724_v7 = vshrl.u32 %v4448_v55, 16  ;;  %v1631_v21 = vmax.f32 %v4382_v58, 0.0  ;;  %v1632_v29 = vmax.f32 %v4384_v5, 0.0 }
 0x271   : > { %v4471_v50 = vor.u32 %v1692_v47, %v1691_v56  ;;  %v1920_v14 = vor.u32 %v1919_v51, %v1689_v61  ;;  %v1712_v0 = vrot.slane %v1710_v16, 7  ;;  %v4477_v54 = vor.u32 %v1699_v32, %v1698_v44  ;;  %v1784_v32 = vld [vmem:[#allocation2 + $0x10] sm:$0xff] }
 0x272   : > { %1947 = vrot.lane.b32.xlu1 %v1916_v11, %s3616_s27  ;;  %v4475_v45 = vpack.c.bf16 %v1630_v43, %v1629_v26  ;;  %v1922_v4 = vor.u32 %v1921_v22, %v1696_v28  ;;  %v4479_v23 = vpack.c.bf16 %v1632_v29, %v1631_v21  ;;  %v1731_v58 = vshrl.u32 %v4457_v2, 16  ;;  %v1781_v22 = vld [vmem:[#allocation2 + $0x8] sm:$0xff]  ;;  %v1787_v26 = vld [vmem:[#allocation2 + $0x18] sm:$0xff] }
 0x273   : > { %v1713_v5 = vshll.u32 %v4424_v39, 16  ;;  %v1633_v6 = vmax.f32 %v4386_v48, 0.0  ;;  %v4488_v31 = vor.u32 %v1706_v49, %v1705_v57  ;;  %v1923_v8 = vrot.slane %v1706_v49, 1  ;;  %v4546_v57 = vld [vmem:[%s4991_s2] sm:$0xff]  }
 0x274   : > { %1857 = vrot.lane.b32.xlu0 %v4410_v3, %s3615_s26  ;;  %v1719_v3 = vrot.slane %v1717_v41, 7  ;;  %v1738_v15 = vshrl.u32 %v4475_v45, 16  ;;  %v1726_v36 = vrot.slane %v1724_v7, 7  ;;  %v1635_v35 = vmax.f32 %v4388_v53, 0.0 }
 0x275   : > { %v4495_v33 = vor.u32 %v1713_v5, %v1712_v0  ;;  %v1720_v34 = vshll.u32 %v4439_v13, 16  ;;  %v4500_v48 = vpack.c.bf16 %v1634_v52, %v1633_v6  ;;  %v1636_v63 = vmax.f32 %v4390_v62, 0.0  ;;  %v1793_v0 = vld [vmem:[#allocation2 + $0x28] sm:$0xff] }
 0x276   : > { %1949 = vrot.lane.b32.xlu1 %v1918_v20, %s3616_s27  ;;  %v1727_v61 = vshll.u32 %v4448_v55, 16  ;;  %v1733_v47 = vrot.slane %v1731_v58, 7  ;;  %v1740_v53 = vrot.slane %v1738_v15, 7  ;;  %v1745_v9 = vshrl.u32 %v4479_v23, 16 }
 0x277   : > { %v4512_v28 = vor.u32 %v1720_v34, %v1719_v3  ;;  %v1734_v19 = vshll.u32 %v4457_v2, 16  ;;  %v4515_v52 = vpack.c.bf16 %v1636_v63, %v1635_v35  ;;  %v1752_v62 = vshrl.u32 %v4500_v48, 16  ;;  %v1796_v3 = vld [vmem:[#allocation2 + $0x30] sm:$0xff]  ;;  %v1799_v63 = vld [vmem:[#allocation2 + $0x38] sm:$0xff] }
 0x278   : > { %1859 = vrot.lane.b32.xlu0 %v4417_v30, %s3615_s26  ;;  %v1729_v12 = vor.u32 %v1727_v61, %v1726_v36  ;;  %v1741_v11 = vshll.u32 %v4475_v45, 16  ;;  %v1747_v46 = vrot.slane %v1745_v9, 7  ;;  %v1785_v40 = vsel %vm3789_vm4, %v4429_v38, %v1784_v32 }
 0x279   : > { %v1748_v25 = vshll.u32 %v4479_v23, 16  ;;  %v1754_v56 = vrot.slane %v1752_v62, 7  ;;  %v1755_v51 = vshll.u32 %v4500_v48, 16  ;;  %v1759_v44 = vshrl.u32 %v4515_v52, 16  ;;  %1786 = vst [vmem:[#allocation2 + $0x10] sm:$0xff] %v1785_v40  ;;  %v1814_v40 = vld [vmem:[#allocation2 + $0x60] sm:$0xff] }
 0x27a   : > { %1951 = vrot.lane.b32.xlu1 %v1920_v14, %s3616_s27  ;;  %v1736_v20 = vor.u32 %v1734_v19, %v1733_v47  ;;  %v1743_v38 = vor.u32 %v1741_v11, %v1740_v53  ;;  %v1782_v49 = vsel %vm3789_vm4, %v4427_v1, %v1781_v22  ;;  %v1788_v43 = vsel %vm3789_vm4, %v4442_v10, %v1787_v26  ;;  %v1790_v10 = vld [vmem:[#allocation2 + $0x20] sm:$0xff]  ;;  %v1805_v53 = vld [vmem:[#allocation2 + $0x48] sm:$0xff]  ;;  %v1823_v22 = vld [vmem:[#allocation2 + $0x78] sm:$0xff] }
 0x27b   : > { %v1750_v21 = vor.u32 %v1748_v25, %v1747_v46  ;;  %v1757_v29 = vor.u32 %v1755_v51, %v1754_v56  ;;  %v1761_v1 = vrot.slane %v1759_v44, 7  ;;  %v1762_v14 = vshll.u32 %v4515_v52, 16  ;;  %1783 = vst [vmem:[#allocation2 + $0x8] sm:$0xff] %v1782_v49  ;;  %1789 = vst [vmem:[#allocation2 + $0x18] sm:$0xff] %v1788_v43  ;;  %v1802_v47 = vld [vmem:[#allocation2 + $0x40] sm:$0xff]  ;;  %v1811_v46 = vld [vmem:[#allocation2 + $0x58] sm:$0xff] }
 0x27c   : > { %1861 = vrot.lane.b32.xlu0 %v4424_v39, %s3615_s26  ;;  %v1794_v6 = vsel %vm3789_vm4, %v4454_v42, %v1793_v0  ;;  %v2120_v36 = vsel %vm789_vm1, %v4405_v17, 0  ;;  %v1797_v35 = vsel %vm3789_vm4, %v4471_v50, %v1796_v3  ;;  %v1925_v32 = vrot.slane %v1713_v5, 1  ;;  %v1808_v50 = vld [vmem:[#allocation2 + $0x50] sm:$0xff]  ;;  %v1826_v26 = vld [vmem:[#allocation2 + $0x80] sm:$0xff] }
 0x27d   : > { %v1764_v42 = vor.u32 %v1762_v14, %v1761_v1  ;;  %1795 = vst [vmem:[#allocation2 + $0x28] sm:$0xff] %v1794_v6  ;;  %3294 = vmatpush3.bf16.msra.mxu1 %v2120_v36  ;;  %1798 = vst [vmem:[#allocation2 + $0x30] sm:$0xff] %v1797_v35  ;;  %v1800_v17 = vsel %vm3789_vm4, %v4477_v54, %v1799_v63  ;;  %v1803_v30 = vsel %vm3789_vm4, %v4488_v31, %v1802_v47  ;;  %v1820_v56 = vld [vmem:[#allocation2 + $0x70] sm:$0xff] }
 0x27e   : > { %1953 = vrot.lane.b32.xlu1 %v1922_v4, %s3616_s27  ;;  %v1791_v4 = vsel %vm3789_vm4, %v4445_v37, %v1790_v10  ;;  %v1924_v37 = vor.u32 %v1923_v8, %v1703_v59  ;;  %3327 = vmatprep.subr.bf16.mxu1 %v4546_v57  ;;  %1801 = vst [vmem:[#allocation2 + $0x38] sm:$0xff] %v1800_v17  ;;  %v1817_v8 = vld [vmem:[#allocation2 + $0x68] sm:$0xff]  ;;  %1804 = vst [vmem:[#allocation2 + $0x40] sm:$0xff] %v1803_v30  ;;  %v1929_v24 = vrot.slane %v1727_v61, 1  ;;  %v4677_v10 = vld [vmem:[%s4991_s2 + $0x18] sm:$0xff]  }
 0x27f   : > { %1792 = vst [vmem:[#allocation2 + $0x20] sm:$0xff] %v1791_v4  ;;  %v1806_v59 = vsel %vm3789_vm4, %v4495_v33, %v1805_v53  ;;  %v1809_v5 = vsel %vm3789_vm4, %v4512_v28, %v1808_v50  ;;  %v1812_v54 = vsel %vm3789_vm4, %v1729_v12, %v1811_v46  ;;  %v1815_v31 = vsel %vm3789_vm4, %v1736_v20, %v1814_v40 }
 0x280   : > { %1863 = vrot.lane.b32.xlu0 %v4439_v13, %s3615_s26  ;;  %1807 = vst [vmem:[#allocation2 + $0x48] sm:$0xff] %v1806_v59  ;;  %1810 = vst [vmem:[#allocation2 + $0x50] sm:$0xff] %v1809_v5  ;;  %v1818_v33 = vsel %vm3789_vm4, %v1743_v38, %v1817_v8  ;;  %v1821_v28 = vsel %vm3789_vm4, %v1750_v21, %v1820_v56  ;;  %v1824_v12 = vsel %vm3789_vm4, %v1757_v29, %v1823_v22 }
 0x281   : > { %1813 = vst [vmem:[#allocation2 + $0x58] sm:$0xff] %v1812_v54  ;;  %1816 = vst [vmem:[#allocation2 + $0x60] sm:$0xff] %v1815_v31  ;;  %v1827_v49 = vsel %vm3789_vm4, %v1764_v42, %v1826_v26  ;;  %v1926_v20 = vor.u32 %v1925_v32, %v1710_v16  ;;  %v1927_v38 = vrot.slane %v1720_v34, 1  ;;  %v1930_v39 = vor.u32 %v1929_v24, %v1724_v7 }
 0x282   : > { %1955 = vrot.lane.b32.xlu1 %v1924_v37, %s3616_s27  ;;  %1819 = vst [vmem:[#allocation2 + $0x68] sm:$0xff] %v1818_v33  ;;  %1822 = vst [vmem:[#allocation2 + $0x70] sm:$0xff] %v1821_v28  ;;  %v1931_v16 = vrot.slane %v1734_v19, 1  ;;  %v1935_v7 = vrot.slane %v1748_v25, 1  ;;  %v1939_v34 = vrot.slane %v1762_v14, 1 }
 0x283   : > { %1825 = vst [vmem:[#allocation2 + $0x78] sm:$0xff] %v1824_v12  ;;  %1828 = vst [vmem:[#allocation2 + $0x80] sm:$0xff] %v1827_v49  ;;  %v1928_v43 = vor.u32 %v1927_v38, %v1717_v41  ;;  %v1933_v41 = vrot.slane %v1741_v11, 1 }
 0x284   : > { %1865 = vrot.lane.b32.xlu0 %v4448_v55, %s3615_s26  ;;  %v1932_v13 = vor.u32 %v1931_v16, %v1731_v58  ;;  %v1936_v58 = vor.u32 %v1935_v7, %v1745_v9 }
 0x285   : > { %v1934_v55 = vor.u32 %v1933_v41, %v1738_v15  ;;  %v1940_v15 = vor.u32 %v1939_v34, %v1759_v44 }
 0x286   : > { %1957 = vrot.lane.b32.xlu1 %v1926_v20, %s3616_s27 }
 0x288   : > { %1867 = vrot.lane.b32.xlu0 %v4457_v2, %s3615_s26  ;;  %v1937_v2 = vrot.slane %v1755_v51, 1  ;;  %v3569_v51 = vld [vmem:[%s4991_s2 + $0x8] ss:$0 sps:$4 sm:$0xff]  }
 0x289   : > { %v2296_v14 = vsel %vm789_vm1, %v3569_v51, 0 }
 0x28a   : > { %1959 = vrot.lane.b32.xlu1 %v1928_v43, %s3616_s27 }
 0x28c   : > { %1869 = vrot.lane.b32.xlu0 %v4475_v45, %s3615_s26  ;;  %v1938_v45 = vor.u32 %v1937_v2, %v1752_v62 }
 0x28e   : > { %1961 = vrot.lane.b32.xlu1 %v1930_v39, %s3616_s27 }
 0x290   : > { %1871 = vrot.lane.b32.xlu0 %v4479_v23, %s3615_s26 }
 0x292   : > { %1963 = vrot.lane.b32.xlu1 %v1932_v13, %s3616_s27 }
 0x294   : > { %1873 = vrot.lane.b32.xlu0 %v4500_v48, %s3615_s26 }
 0x296   : > { %1965 = vrot.lane.b32.xlu1 %v1934_v55, %s3616_s27 }
 0x298   : > { %1875 = vrot.lane.b32.xlu0 %v4515_v52, %s3615_s26 }
 0x29a   : > { %1967 = vrot.lane.b32.xlu1 %v1936_v58, %s3616_s27 }
 0x29c   : > { %1969 = vrot.lane.b32.xlu0 %v1938_v45, %s3616_s27 }
 0x29e   : > { %1971 = vrot.lane.b32.xlu1 %v1940_v15, %s3616_s27  ;;  %s3074_s27 = sshll.u32 %s5000_s16, 8 }
 0x29f   : > { %s4849_s16 = scalar_lea.vmem %s4993_s4, %s3074_s27 }
 0x2cc   : > { %v1848_v61 = vpop.permute.xlu1 %1847 }
 0x2cd   : > { %1894 = vst.msk [vmem:[#allocation2 + $0x10] sm:$0xff] %vm559_vm5, %v1848_v61 }
 0x2d2   : > { %v1846_v23 = vpop.permute.xlu0 %1845 }
 0x2d3   : > { %1893 = vst.msk [vmem:[#allocation2 + $0x8] sm:$0xff] %vm559_vm5, %v1846_v23 }
 0x2d4   : > { %v1992_v52 = vld [vmem:[#allocation2 + $0x10] sm:$0xff] }
 0x2d6   : > { %v1850_v9 = vpop.permute.xlu0 %1849 }
 0x2d7   : > { %1895 = vst.msk [vmem:[#allocation2 + $0x18] sm:$0xff] %vm559_vm5, %v1850_v9 }
 0x2d8   : > { %v1942_v19 = vpop.permute.xlu1 %1941 }
 0x2da   : > { %v1989_v11 = vld [vmem:[#allocation2 + $0x8] sm:$0xff]  ;;  %v1852_v48 = vpop.permute.xlu0 %1851 }
 0x2db   : > { %v4654_v62 = vsel %vm3908_vm8, %v1942_v19, %v1989_v11  ;;  %1896 = vst.msk [vmem:[#allocation2 + $0x20] sm:$0xff] %vm559_vm5, %v1852_v48 }
 0x2dc   : > { %1991 = vst [vmem:[#allocation2 + $0x8] sm:$0xff] %v4654_v62  ;;  %v1944_v25 = vpop.permute.xlu1 %1943  ;;  %3295 = vmatprep.mubr.msk.bf16.mxu1 %vm199_vm0, %v4654_v62 }
 0x2dd   : > { %v4665_v44 = vsel %vm3908_vm8, %v1944_v25, %v1992_v52  ;;  %v2037_v52 = vld [vmem:[#allocation2] sm:$0xff] }
 0x2de   : > { %1994 = vst [vmem:[#allocation2 + $0x10] sm:$0xff] %v4665_v44  ;;  %v1854_v21 = vpop.permute.xlu0 %1853  ;;  %3296 = vmatmul.mubr.msk.bf16.vlgmr.msra.gmra.mrb[0].mxu1 %vm199_vm0, %v4665_v44  ;;  %v1995_v29 = vld [vmem:[#allocation2 + $0x18] sm:$0xff]  ;;  %v3571_v25 = vld [vmem:[%s4991_s2 + $0x20] ss:$0 sps:$4 sm:$0xff]  }
 0x2df   : > { %1897 = vst.msk [vmem:[#allocation2 + $0x28] sm:$0xff] %vm559_vm5, %v1854_v21  ;;  %3328 = vmatpush3.bf16.msra.mxu1 %v4546_v57  ;;  %v2476_v18 = vsel %vm789_vm1, %v3571_v25, 0 }
 0x2e0   : > { %v1946_v1 = vpop.permute.xlu1 %1945  ;;  %3531 = vmatprep.subr.msk.bf16.mxu1 %vm789_vm1, %v3569_v51  ;;  %v2705_v51 = vsub.s32 4, %v4312_v60 }
 0x2e1   : > { %v4681_v0 = vsel %vm3908_vm8, %v1946_v1, %v1995_v29 }
 0x2e2   : > { %1997 = vst [vmem:[#allocation2 + $0x18] sm:$0xff] %v4681_v0  ;;  %v1856_v3 = vpop.permute.xlu0 %1855  ;;  %3299 = vmatprep.mubr.msk.bf16.mxu1 %vm199_vm0, %v4681_v0  ;;  %v1998_v57 = vld [vmem:[#allocation2 + $0x20] sm:$0xff]  ;;  %v4831_v21 = vrot.slane %v4310_v27, %v2705_v51 }
 0x2e3   : > { %1898 = vst.msk [vmem:[#allocation2 + $0x30] sm:$0xff] %vm559_vm5, %v1856_v3  ;;  %3330 = vmatpush3.bf16.msra.mxu1 %v2296_v14  ;;  %v3590_v14 = vld [vmem:[%s3686_s25 + $0x8] sm:$0xff]  }
 0x2e4   : > { %v1948_v4 = vpop.permute.xlu1 %1947  ;;  %3363 = vmatprep.subr.bf16.mxu1 %v4677_v10 }
 0x2e5   : > { %v4690_v6 = vsel %vm3908_vm8, %v1948_v4, %v1998_v57  ;;  %v3591_v57 = vld [vmem:[%s3686_s25] sm:$0xff]  }
 0x2e6   : > { %2000 = vst [vmem:[#allocation2 + $0x20] sm:$0xff] %v4690_v6  ;;  %v1858_v36 = vpop.permute.xlu0 %1857  ;;  %3300 = vmatmul.mubr.msk.bf16.gmra.mrb[4].mxu1 %vm199_vm0, %v4690_v6  ;;  %v2001_v35 = vld [vmem:[#allocation2 + $0x28] sm:$0xff]  ;;  %v2671_v4 = vunpack.c.l.bf16 %v3591_v57 }
 0x2e7   : > { %1899 = vst.msk [vmem:[#allocation2 + $0x38] sm:$0xff] %vm559_vm5, %v1858_v36 }
 0x2e8   : > { %v1950_v63 = vpop.permute.xlu1 %1949 }
 0x2e9   : > { %v4698_v47 = vsel %vm3908_vm8, %v1950_v63, %v2001_v35  ;;  %v2674_v35 = vunpack.c.h.bf16 %v3590_v14 }
 0x2ea   : > { %2003 = vst [vmem:[#allocation2 + $0x28] sm:$0xff] %v4698_v47  ;;  %v1860_v53 = vpop.permute.xlu0 %1859  ;;  %3303 = vmatprep.mubr.msk.bf16.mxu1 %vm199_vm0, %v4698_v47  ;;  %v2004_v37 = vld [vmem:[#allocation2 + $0x30] sm:$0xff] }
 0x2eb   : > { %1900 = vst.msk [vmem:[#allocation2 + $0x40] sm:$0xff] %vm559_vm5, %v1860_v53 }
 0x2ec   : > { %v1952_v32 = vpop.permute.xlu1 %1951 }
 0x2ed   : > { %v4706_v42 = vsel %vm3908_vm8, %v1952_v32, %v2004_v37 }
 0x2ee   : > { %2006 = vst [vmem:[#allocation2 + $0x30] sm:$0xff] %v4706_v42  ;;  %v1862_v17 = vpop.permute.xlu0 %1861  ;;  %3304 = vmatmul.mubr.msk.bf16.gmra.mrb[8].mxu1 %vm199_vm0, %v4706_v42  ;;  %v2007_v50 = vld [vmem:[#allocation2 + $0x38] sm:$0xff] }
 0x2ef   : > { %1901 = vst.msk [vmem:[#allocation2 + $0x48] sm:$0xff] %vm559_vm5, %v1862_v17 }
 0x2f0   : > { %v1954_v46 = vpop.permute.xlu1 %1953 }
 0x2f1   : > { %v4714_v40 = vsel %vm3908_vm8, %v1954_v46, %v2007_v50 }
 0x2f2   : > { %2009 = vst [vmem:[#allocation2 + $0x38] sm:$0xff] %v4714_v40  ;;  %v1864_v30 = vpop.permute.xlu0 %1863  ;;  %3307 = vmatprep.mubr.msk.bf16.mxu1 %vm199_vm0, %v4714_v40  ;;  %v2010_v59 = vld [vmem:[#allocation2 + $0x40] sm:$0xff] }
 0x2f3   : > { %1902 = vst.msk [vmem:[#allocation2 + $0x50] sm:$0xff] %vm559_vm5, %v1864_v30 }
 0x2f4   : > { %v1956_v5 = vpop.permute.xlu1 %1955 }
 0x2f5   : > { %v4722_v54 = vsel %vm3908_vm8, %v1956_v5, %v2010_v59 }
 0x2f6   : > { %2012 = vst [vmem:[#allocation2 + $0x40] sm:$0xff] %v4722_v54  ;;  %v1866_v8 = vpop.permute.xlu0 %1865  ;;  %3308 = vmatmul.mubr.msk.bf16.gmra.mrb[12].mxu1 %vm199_vm0, %v4722_v54  ;;  %v2013_v56 = vld [vmem:[#allocation2 + $0x48] sm:$0xff] }
 0x2f7   : > { %1903 = vst.msk [vmem:[#allocation2 + $0x58] sm:$0xff] %vm559_vm5, %v1866_v8 }
 0x2f8   : > { %v1958_v22 = vpop.permute.xlu1 %1957 }
 0x2f9   : > { %v4730_v31 = vsel %vm3908_vm8, %v1958_v22, %v2013_v56 }
 0x2fa   : > { %2015 = vst [vmem:[#allocation2 + $0x48] sm:$0xff] %v4730_v31  ;;  %v1868_v33 = vpop.permute.xlu0 %1867  ;;  %3311 = vmatprep.mubr.msk.bf16.mxu1 %vm199_vm0, %v4730_v31  ;;  %v2016_v28 = vld [vmem:[#allocation2 + $0x50] sm:$0xff] }
 0x2fb   : > { %1904 = vst.msk [vmem:[#allocation2 + $0x60] sm:$0xff] %vm559_vm5, %v1868_v33  ;;  %v3593_v33 = vld [vmem:[%s3686_s25 + $0x10] sm:$0xff]  }
 0x2fc   : > { %v1960_v12 = vpop.permute.xlu1 %1959 }
 0x2fd   : > { %v4738_v26 = vsel %vm3908_vm8, %v1960_v12, %v2016_v28  ;;  %v2675_v28 = vunpack.c.l.bf16 %v3593_v33 }
 0x2fe   : > { %2018 = vst [vmem:[#allocation2 + $0x50] sm:$0xff] %v4738_v26  ;;  %v1870_v49 = vpop.permute.xlu0 %1869  ;;  %3312 = vmatmul.mubr.msk.bf16.gmra.mrb[16].mxu1 %vm199_vm0, %v4738_v26  ;;  %v2019_v20 = vld [vmem:[#allocation2 + $0x58] sm:$0xff] }
 0x2ff   : > { %1905 = vst.msk [vmem:[#allocation2 + $0x68] sm:$0xff] %vm559_vm5, %v1870_v49 }
 0x300   : > { %v1962_v38 = vpop.permute.xlu1 %1961 }
 0x301   : > { %v4746_v43 = vsel %vm3908_vm8, %v1962_v38, %v2019_v20 }
 0x302   : > { %2021 = vst [vmem:[#allocation2 + $0x58] sm:$0xff] %v4746_v43  ;;  %v1872_v24 = vpop.permute.xlu0 %1871  ;;  %3315 = vmatprep.mubr.msk.bf16.mxu1 %vm199_vm0, %v4746_v43  ;;  %v2022_v39 = vld [vmem:[#allocation2 + $0x60] sm:$0xff] }
 0x303   : > { %1906 = vst.msk [vmem:[#allocation2 + $0x70] sm:$0xff] %vm559_vm5, %v1872_v24 }
 0x304   : > { %v1964_v16 = vpop.permute.xlu1 %1963 }
 0x305   : > { %v2023_v13 = vsel %vm3908_vm8, %v1964_v16, %v2022_v39  ;;  %v2676_v39 = vunpack.c.h.bf16 %v3593_v33 }
 0x306   : > { %2024 = vst [vmem:[#allocation2 + $0x60] sm:$0xff] %v2023_v13  ;;  %v1874_v41 = vpop.permute.xlu0 %1873  ;;  %3316 = vmatmul.mubr.msk.bf16.gmra.mrb[20].mxu1 %vm199_vm0, %v2023_v13  ;;  %v2025_v55 = vld [vmem:[#allocation2 + $0x68] sm:$0xff] }
 0x307   : > { %1907 = vst.msk [vmem:[#allocation2 + $0x78] sm:$0xff] %vm559_vm5, %v1874_v41 }
 0x308   : > { %v1966_v7 = vpop.permute.xlu1 %1965 }
 0x309   : > { %v2026_v2 = vsel %vm3908_vm8, %v1966_v7, %v2025_v55 }
 0x30a   : > { %2027 = vst [vmem:[#allocation2 + $0x68] sm:$0xff] %v2026_v2  ;;  %v1876_v58 = vpop.permute.xlu0 %1875  ;;  %3319 = vmatprep.mubr.msk.bf16.mxu1 %vm199_vm0, %v2026_v2  ;;  %v2028_v34 = vld [vmem:[#allocation2 + $0x70] sm:$0xff] }
 0x30b   : > { %1908 = vst.msk [vmem:[#allocation2 + $0x80] sm:$0xff] %vm559_vm5, %v1876_v58 }
 0x30c   : > { %v1968_v45 = vpop.permute.xlu1 %1967 }
 0x30d   : > { %v2029_v15 = vsel %vm3908_vm8, %v1968_v45, %v2028_v34 }
 0x30e   : > { %2030 = vst [vmem:[#allocation2 + $0x70] sm:$0xff] %v2029_v15  ;;  %v2031_v61 = vld [vmem:[#allocation2 + $0x78] sm:$0xff]  ;;  %v1970_v23 = vpop.permute.xlu0 %1969  ;;  %3320 = vmatmul.mubr.msk.bf16.gmra.mrb[24].mxu1 %vm199_vm0, %v2029_v15 }
 0x30f   : > { %v2032_v9 = vsel %vm3908_vm8, %v1970_v23, %v2031_v61  ;;  %v3594_v23 = vld [vmem:[%s3686_s25 + $0x28] sm:$0xff]  }
 0x310   : > { %2033 = vst [vmem:[#allocation2 + $0x78] sm:$0xff] %v2032_v9  ;;  %3323 = vmatprep.mubr.msk.bf16.mxu1 %vm199_vm0, %v2032_v9  ;;  %v1972_v11 = vpop.permute.xlu1 %1971 }
 0x312   : > { %v2034_v19 = vld [vmem:[#allocation2 + $0x80] sm:$0xff] }
 0x313   : > { %v2035_v48 = vsel %vm3908_vm8, %v1972_v11, %v2034_v19 }
 0x314   : > { %2036 = vst [vmem:[#allocation2 + $0x80] sm:$0xff] %v2035_v48 }
 0x316   : > { %3324 = vmatmul.mubr.msk.bf16.gmra.mrb[28].mxu1 %vm199_vm0, %v2035_v48 }
 0x317   : > { %3331 = vmatprep.mubr.msk.bf16.mxu1 %vm199_vm0, %v2037_v52  ;;  %v3595_v52 = vld [vmem:[%s3686_s25 + $0x20] sm:$0xff]  }
 0x31e   : > { %3332 = vmatmul.mubr.msk.bf16.vlgmr.msra.gmra.mrb[0].mxu1 %vm199_vm0, %v4654_v62  ;;  %v2054_v62 = vld [vmem:[#allocation2 + $0x88] sm:$0xff] }
 0x31f   : > { %3364 = vmatpush3.bf16.msra.mxu1 %v4677_v10  ;;  %3335 = vmatprep.mubr.msk.bf16.mxu1 %vm199_vm0, %v4665_v44  ;;  %v2673_v10 = vunpack.c.l.bf16 %v3590_v14 }
 0x320   : > { %3532 = vmatprep.subr.msk.bf16.mxu1 %vm789_vm1, %v3571_v25  ;;  %v2679_v25 = vunpack.c.l.bf16 %v3595_v52 }
 0x323   : > { %3366 = vmatpush3.bf16.msra.mxu1 %v2476_v18 }
 0x326   : > { %3336 = vmatmul.mubr.msk.bf16.gmra.mrb[4].mxu1 %vm199_vm0, %v4681_v0 }
 0x327   : > { %3339 = vmatprep.mubr.msk.bf16.mxu1 %vm199_vm0, %v4690_v6 }
 0x32e   : > { %3340 = vmatmul.mubr.msk.bf16.gmra.mrb[8].mxu1 %vm199_vm0, %v4698_v47 }
 0x32f   : > { %3343 = vmatprep.mubr.msk.bf16.mxu1 %vm199_vm0, %v4706_v42 }
 0x336   : > { %3344 = vmatmul.mubr.msk.bf16.gmra.mrb[12].mxu1 %vm199_vm0, %v4714_v40 }
 0x337   : > { %3347 = vmatprep.mubr.msk.bf16.mxu1 %vm199_vm0, %v4722_v54 }
 0x33e   : > { %3348 = vmatmul.mubr.msk.bf16.gmra.mrb[16].mxu1 %vm199_vm0, %v4730_v31 }
 0x33f   : > { %3351 = vmatprep.mubr.msk.bf16.mxu1 %vm199_vm0, %v4738_v26 }
 0x346   : > { %3352 = vmatmul.mubr.msk.bf16.gmra.mrb[20].mxu1 %vm199_vm0, %v4746_v43 }
 0x347   : > { %3355 = vmatprep.mubr.msk.bf16.mxu1 %vm199_vm0, %v2023_v13 }
 0x34e   : > { %3356 = vmatmul.mubr.msk.bf16.gmra.mrb[24].mxu1 %vm199_vm0, %v2026_v2 }
 0x34f   : > { %3359 = vmatprep.mubr.msk.bf16.mxu1 %vm199_vm0, %v2029_v15 }
 0x356   : > { %3360 = vmatmul.mubr.msk.bf16.gmra.mrb[28].mxu1 %vm199_vm0, %v2032_v9 }
 0x357   : > { %3367 = vmatprep.mubr.msk.bf16.mxu1 %vm199_vm0, %v4665_v44  ;;  %v2741_v44 = vsub.s32 5, %v4312_v60 }
 0x359   : > { %v4834_v29 = vrot.slane %v4310_v27, %v2741_v44  ;;  %v2682_v44 = vunpack.c.h.bf16 %v3594_v23 }
 0x35e   : > { %3368 = vmatmul.mubr.msk.bf16.vlgmr.msra.gmra.mrb[0].mxu1 %vm199_vm0, %v4681_v0 }
 0x35f   : > { %3371 = vmatprep.mubr.msk.bf16.mxu1 %vm199_vm0, %v4690_v6 }
 0x366   : > { %3372 = vmatmul.mubr.msk.bf16.gmra.mrb[4].mxu1 %vm199_vm0, %v4698_v47  ;;  %v2672_v47 = vunpack.c.h.bf16 %v3591_v57 }
 0x367   : > { %3375 = vmatprep.mubr.msk.bf16.mxu1 %vm199_vm0, %v4706_v42 }
 0x36e   : > { %3376 = vmatmul.mubr.msk.bf16.gmra.mrb[8].mxu1 %vm199_vm0, %v4714_v40 }
 0x36f   : > { %3379 = vmatprep.mubr.msk.bf16.mxu1 %vm199_vm0, %v4722_v54  ;;  %v3592_v54 = vld [vmem:[%s3686_s25 + $0x18] sm:$0xff]  }
 0x370   : > { %v2677_v8 = vunpack.c.l.bf16 %v3592_v54  ;;  %v2678_v20 = vunpack.c.h.bf16 %v3592_v54 }
 0x376   : > { %3380 = vmatmul.mubr.msk.bf16.gmra.mrb[12].mxu1 %vm199_vm0, %v4730_v31 }
 0x377   : > { %3383 = vmatprep.mubr.msk.bf16.mxu1 %vm199_vm0, %v4738_v26 }
 0x37e   : > { %3384 = vmatmul.mubr.msk.bf16.gmra.mrb[16].mxu1 %vm199_vm0, %v4746_v43 }
 0x37f   : > { %3387 = vmatprep.mubr.msk.bf16.mxu1 %vm199_vm0, %v2023_v13 }
 0x386   : > { %3388 = vmatmul.mubr.msk.bf16.gmra.mrb[20].mxu1 %vm199_vm0, %v2026_v2 }
 0x387   : > { %3391 = vmatprep.mubr.msk.bf16.mxu1 %vm199_vm0, %v2029_v15 }
 0x38e   : > { %3392 = vmatmul.mubr.msk.bf16.gmra.mrb[24].mxu1 %vm199_vm0, %v2032_v9  ;;  %v2681_v9 = vunpack.c.l.bf16 %v3594_v23 }
 0x38f   : > { %3395 = vmatprep.mubr.msk.bf16.mxu1 %vm199_vm0, %v2035_v48 }
 0x396   : > { %3396 = vmatmul.mubr.msk.bf16.gmra.mrb[28].mxu1 %vm199_vm0, %v2054_v62 }
 0x431   : > { %v3369_v1 = vpop.f32.mrb[0].mxu1 }
 0x432   : > { %v2709_v0 = vmul.f32 %v3369_v1, %v4831_v21  ;;  %v2512_v3 = vpop.f32.mrb[1].mxu1 }
 0x433   : > { %v2707_v6 = vmul.f32 %v4831_v21, %v2512_v3  ;;  %v3370_v36 = vpop.f32.mrb[2].mxu1 }
 0x434   : > { %v2745_v60 = vadd.f32 %v4834_v29, %v2709_v0  ;;  %v2710_v63 = vmul.f32 %v3370_v36, %v4831_v21  ;;  %v2515_v27 = vpop.f32.mrb[3].mxu1  ;;  %v2680_v0 = vunpack.c.h.bf16 %v3595_v52 }
 0x435   : > { %v2743_v53 = vadd.f32 %v4834_v29, %v2707_v6  ;;  %v2708_v37 = vmul.f32 %v4831_v21, %v2515_v27 }
 0x436   : > { %v2777_v32 = vadd.f32 %v2745_v60, %v2673_v10  ;;  %v2746_v42 = vadd.f32 %v4834_v29, %v2710_v63 }
 0x437   : > { %v2775_v17 = vadd.f32 %v2743_v53, %v2671_v4  ;;  %v2744_v50 = vadd.f32 %v4834_v29, %v2708_v37  ;;  %v3596_v37 = vld [vmem:[%s3686_s25 + $0x38] sm:$0xff]  }
 0x438   : > { %v2809_v46 = vmax.f32 %v2777_v32, 0.0  ;;  %v2778_v40 = vadd.f32 %v2746_v42, %v2674_v35  ;;  %v2685_v32 = vunpack.c.l.bf16 %v3596_v37  ;;  %v2686_v54 = vunpack.c.h.bf16 %v3596_v37 }
 0x439   : > { %v2807_v30 = vmax.f32 %v2775_v17, 0.0  ;;  %v2776_v59 = vadd.f32 %v2744_v50, %v2672_v47  ;;  %v3373_v5 = vpop.f32.mrb[4].mxu1 }
 0x43a   : > { %2841 = vst.msk [vmem:[%s4849_s16 + $0x10] sm:$0xff] %vm460_vm2, %v2809_v46  ;;  %v2810_v56 = vmax.f32 %v2778_v40, 0.0  ;;  %v2713_v22 = vmul.f32 %v3373_v5, %v4831_v21  ;;  %v2528_v31 = vpop.f32.mrb[5].mxu1  ;;  %v3597_v46 = vld [vmem:[%s3686_s25 + $0x30] sm:$0xff]  }
 0x43b   : > { %2839 = vst.msk [vmem:[%s4849_s16] sm:$0xff] %vm460_vm2, %v2807_v30  ;;  %v2808_v12 = vmax.f32 %v2776_v59, 0.0  ;;  %v2711_v26 = vmul.f32 %v4831_v21, %v2528_v31  ;;  %v3374_v49 = vpop.f32.mrb[6].mxu1  ;;  %v2683_v40 = vunpack.c.l.bf16 %v3597_v46  ;;  %v2684_v31 = vunpack.c.h.bf16 %v3597_v46 }
 0x43c   : > { %2842 = vst.msk [vmem:[%s4849_s16 + $0x18] sm:$0xff] %vm460_vm2, %v2810_v56  ;;  %v2749_v38 = vadd.f32 %v4834_v29, %v2713_v22  ;;  %v2714_v43 = vmul.f32 %v3374_v49, %v4831_v21  ;;  %v2531_v24 = vpop.f32.mrb[7].mxu1 }
 0x43d   : > { %2840 = vst.msk [vmem:[%s4849_s16 + $0x8] sm:$0xff] %vm460_vm2, %v2808_v12  ;;  %v2747_v16 = vadd.f32 %v4834_v29, %v2711_v26  ;;  %v2712_v13 = vmul.f32 %v4831_v21, %v2531_v24 }
 0x43e   : > { %v2781_v41 = vadd.f32 %v2749_v38, %v2677_v8  ;;  %v2750_v55 = vadd.f32 %v4834_v29, %v2714_v43 }
 0x43f   : > { %v2779_v7 = vadd.f32 %v2747_v16, %v2675_v28  ;;  %v2748_v2 = vadd.f32 %v4834_v29, %v2712_v13  ;;  %v3598_v13 = vld [vmem:[%s3686_s25 + $0x48] sm:$0xff]  }
 0x440   : > { %v2813_v58 = vmax.f32 %v2781_v41, 0.0  ;;  %v2782_v34 = vadd.f32 %v2750_v55, %v2678_v20  ;;  %v2689_v41 = vunpack.c.l.bf16 %v3598_v13  ;;  %v2690_v23 = vunpack.c.h.bf16 %v3598_v13 }
 0x441   : > { %v2811_v45 = vmax.f32 %v2779_v7, 0.0  ;;  %v2780_v15 = vadd.f32 %v2748_v2, %v2676_v39  ;;  %v3377_v61 = vpop.f32.mrb[8].mxu1 }
 0x442   : > { %2845 = vst.msk [vmem:[%s4849_s16 + $0x30] sm:$0xff] %vm460_vm2, %v2813_v58  ;;  %v2814_v19 = vmax.f32 %v2782_v34, 0.0  ;;  %v2717_v11 = vmul.f32 %v3377_v61, %v4831_v21  ;;  %v2544_v48 = vpop.f32.mrb[9].mxu1  ;;  %v3599_v58 = vld [vmem:[%s3686_s25 + $0x40] sm:$0xff]  }
 0x443   : > { %2843 = vst.msk [vmem:[%s4849_s16 + $0x20] sm:$0xff] %vm460_vm2, %v2811_v45  ;;  %v2812_v18 = vmax.f32 %v2780_v15, 0.0  ;;  %v2715_v62 = vmul.f32 %v4831_v21, %v2544_v48  ;;  %v3378_v51 = vpop.f32.mrb[10].mxu1  ;;  %v2687_v34 = vunpack.c.l.bf16 %v3599_v58  ;;  %v2688_v48 = vunpack.c.h.bf16 %v3599_v58 }
 0x444   : > { %2846 = vst.msk [vmem:[%s4849_s16 + $0x38] sm:$0xff] %vm460_vm2, %v2814_v19  ;;  %v2753_v1 = vadd.f32 %v4834_v29, %v2717_v11  ;;  %v2718_v14 = vmul.f32 %v3378_v51, %v4831_v21  ;;  %v2547_v10 = vpop.f32.mrb[11].mxu1 }
 0x445   : > { %2844 = vst.msk [vmem:[%s4849_s16 + $0x28] sm:$0xff] %vm460_vm2, %v2812_v18  ;;  %v2751_v3 = vadd.f32 %v4834_v29, %v2715_v62  ;;  %v2716_v57 = vmul.f32 %v4831_v21, %v2547_v10 }
 0x446   : > { %v2785_v4 = vadd.f32 %v2753_v1, %v2681_v9  ;;  %v2754_v6 = vadd.f32 %v4834_v29, %v2718_v14 }
 0x447   : > { %v2783_v36 = vadd.f32 %v2751_v3, %v2679_v25  ;;  %v2752_v35 = vadd.f32 %v4834_v29, %v2716_v57  ;;  %v3600_v57 = vld [vmem:[%s3686_s25 + $0x58] sm:$0xff]  }
 0x448   : > { %v2817_v60 = vmax.f32 %v2785_v4, 0.0  ;;  %v2786_v63 = vadd.f32 %v2754_v6, %v2682_v44  ;;  %v2693_v4 = vunpack.c.l.bf16 %v3600_v57  ;;  %v2694_v37 = vunpack.c.h.bf16 %v3600_v57 }
 0x449   : > { %v2815_v27 = vmax.f32 %v2783_v36, 0.0  ;;  %v2784_v47 = vadd.f32 %v2752_v35, %v2680_v0  ;;  %v3381_v53 = vpop.f32.mrb[12].mxu1 }
 0x44a   : > { %2849 = vst.msk [vmem:[%s4849_s16 + $0x50] sm:$0xff] %vm460_vm2, %v2817_v60  ;;  %v2818_v42 = vmax.f32 %v2786_v63, 0.0  ;;  %v2721_v17 = vmul.f32 %v3381_v53, %v4831_v21  ;;  %v2560_v50 = vpop.f32.mrb[13].mxu1  ;;  %v3601_v60 = vld [vmem:[%s3686_s25 + $0x50] sm:$0xff]  }
 0x44b   : > { %2847 = vst.msk [vmem:[%s4849_s16 + $0x40] sm:$0xff] %vm460_vm2, %v2815_v27  ;;  %v2816_v30 = vmax.f32 %v2784_v47, 0.0  ;;  %v2719_v59 = vmul.f32 %v4831_v21, %v2560_v50  ;;  %v3382_v5 = vpop.f32.mrb[14].mxu1  ;;  %v2691_v63 = vunpack.c.l.bf16 %v3601_v60  ;;  %v2692_v50 = vunpack.c.h.bf16 %v3601_v60 }
 0x44c   : > { %2850 = vst.msk [vmem:[%s4849_s16 + $0x58] sm:$0xff] %vm460_vm2, %v2818_v42  ;;  %v2757_v8 = vadd.f32 %v4834_v29, %v2721_v17  ;;  %v2722_v56 = vmul.f32 %v3382_v5, %v4831_v21  ;;  %v2563_v22 = vpop.f32.mrb[15].mxu1 }
 0x44d   : > { %2848 = vst.msk [vmem:[%s4849_s16 + $0x48] sm:$0xff] %vm460_vm2, %v2816_v30  ;;  %v2755_v33 = vadd.f32 %v4834_v29, %v2719_v59  ;;  %v2720_v28 = vmul.f32 %v4831_v21, %v2563_v22 }
 0x44e   : > { %v2789_v12 = vadd.f32 %v2757_v8, %v2685_v32  ;;  %v2758_v26 = vadd.f32 %v4834_v29, %v2722_v56 }
 0x44f   : > { %v2787_v49 = vadd.f32 %v2755_v33, %v2683_v40  ;;  %v2756_v20 = vadd.f32 %v4834_v29, %v2720_v28  ;;  %v3602_v28 = vld [vmem:[%s3686_s25 + $0x68] sm:$0xff]  }
 0x450   : > { %v2821_v38 = vmax.f32 %v2789_v12, 0.0  ;;  %v2790_v43 = vadd.f32 %v2758_v26, %v2686_v54  ;;  %v2697_v12 = vunpack.c.l.bf16 %v3602_v28  ;;  %v2698_v13 = vunpack.c.h.bf16 %v3602_v28 }
 0x451   : > { %v2819_v24 = vmax.f32 %v2787_v49, 0.0  ;;  %v2788_v39 = vadd.f32 %v2756_v20, %v2684_v31  ;;  %v3385_v16 = vpop.f32.mrb[16].mxu1 }
 0x452   : > { %2853 = vst.msk [vmem:[%s4849_s16 + $0x70] sm:$0xff] %vm460_vm2, %v2821_v38  ;;  %v2822_v55 = vmax.f32 %v2790_v43, 0.0  ;;  %v2725_v7 = vmul.f32 %v3385_v16, %v4831_v21  ;;  %v2576_v2 = vpop.f32.mrb[17].mxu1  ;;  %v3603_v38 = vld [vmem:[%s3686_s25 + $0x60] sm:$0xff]  }
 0x453   : > { %2851 = vst.msk [vmem:[%s4849_s16 + $0x60] sm:$0xff] %vm460_vm2, %v2819_v24  ;;  %v2820_v45 = vmax.f32 %v2788_v39, 0.0  ;;  %v2723_v15 = vmul.f32 %v4831_v21, %v2576_v2  ;;  %v3386_v61 = vpop.f32.mrb[18].mxu1  ;;  %v2695_v43 = vunpack.c.l.bf16 %v3603_v38  ;;  %v2696_v2 = vunpack.c.h.bf16 %v3603_v38 }
 0x454   : > { %2854 = vst.msk [vmem:[%s4849_s16 + $0x78] sm:$0xff] %vm460_vm2, %v2822_v55  ;;  %v2761_v9 = vadd.f32 %v4834_v29, %v2725_v7  ;;  %v2726_v19 = vmul.f32 %v3386_v61, %v4831_v21  ;;  %v2579_v11 = vpop.f32.mrb[19].mxu1 }
 0x455   : > { %2852 = vst.msk [vmem:[%s4849_s16 + $0x68] sm:$0xff] %vm460_vm2, %v2820_v45  ;;  %v2759_v52 = vadd.f32 %v4834_v29, %v2723_v15  ;;  %v2724_v25 = vmul.f32 %v4831_v21, %v2579_v11 }
 0x456   : > { %v2793_v18 = vadd.f32 %v2761_v9, %v2689_v41  ;;  %v2762_v62 = vadd.f32 %v4834_v29, %v2726_v19 }
 0x457   : > { %v2791_v51 = vadd.f32 %v2759_v52, %v2687_v34  ;;  %v2760_v44 = vadd.f32 %v4834_v29, %v2724_v25  ;;  %v3604_v25 = vld [vmem:[%s3686_s25 + $0x78] sm:$0xff]  }
 0x458   : > { %v2825_v1 = vmax.f32 %v2793_v18, 0.0  ;;  %v2794_v14 = vadd.f32 %v2762_v62, %v2690_v23  ;;  %v2701_v18 = vunpack.c.l.bf16 %v3604_v25  ;;  %v2702_v57 = vunpack.c.h.bf16 %v3604_v25 }
 0x459   : > { %v2823_v10 = vmax.f32 %v2791_v51, 0.0  ;;  %v2792_v0 = vadd.f32 %v2760_v44, %v2688_v48  ;;  %v3389_v3 = vpop.f32.mrb[20].mxu1 }
 0x45a   : > { %2857 = vst.msk [vmem:[%s4849_s16 + $0x90] sm:$0xff] %vm460_vm2, %v2825_v1  ;;  %v2826_v6 = vmax.f32 %v2794_v14, 0.0  ;;  %v2729_v36 = vmul.f32 %v3389_v3, %v4831_v21  ;;  %v2592_v35 = vpop.f32.mrb[21].mxu1  ;;  %v3605_v1 = vld [vmem:[%s3686_s25 + $0x70] sm:$0xff]  }
 0x45b   : > { %2855 = vst.msk [vmem:[%s4849_s16 + $0x80] sm:$0xff] %vm460_vm2, %v2823_v10  ;;  %v2824_v27 = vmax.f32 %v2792_v0, 0.0  ;;  %v2727_v47 = vmul.f32 %v4831_v21, %v2592_v35  ;;  %v3390_v53 = vpop.f32.mrb[22].mxu1  ;;  %v2699_v14 = vunpack.c.l.bf16 %v3605_v1  ;;  %v2700_v35 = vunpack.c.h.bf16 %v3605_v1 }
 0x45c   : > { %2858 = vst.msk [vmem:[%s4849_s16 + $0x98] sm:$0xff] %vm460_vm2, %v2826_v6  ;;  %v2765_v32 = vadd.f32 %v4834_v29, %v2729_v36  ;;  %v2730_v42 = vmul.f32 %v3390_v53, %v4831_v21  ;;  %v2595_v17 = vpop.f32.mrb[23].mxu1 }
 0x45d   : > { %2856 = vst.msk [vmem:[%s4849_s16 + $0x88] sm:$0xff] %vm460_vm2, %v2824_v27  ;;  %v2763_v46 = vadd.f32 %v4834_v29, %v2727_v47  ;;  %v2728_v40 = vmul.f32 %v4831_v21, %v2595_v17 }
 0x45e   : > { %v2797_v30 = vadd.f32 %v2765_v32, %v2693_v4  ;;  %v2766_v59 = vadd.f32 %v4834_v29, %v2730_v42 }
 0x45f   : > { %v2795_v5 = vadd.f32 %v2763_v46, %v2691_v63  ;;  %v2764_v54 = vadd.f32 %v4834_v29, %v2728_v40 }
 0x460   : > { %v2829_v8 = vmax.f32 %v2797_v30, 0.0  ;;  %v2798_v56 = vadd.f32 %v2766_v59, %v2694_v37 }
 0x461   : > { %v2827_v22 = vmax.f32 %v2795_v5, 0.0  ;;  %v2796_v31 = vadd.f32 %v2764_v54, %v2692_v50  ;;  %v3393_v33 = vpop.f32.mrb[24].mxu1 }
 0x462   : > { %2861 = vst.msk [vmem:[%s4849_s16 + $0xb0] sm:$0xff] %vm460_vm2, %v2829_v8  ;;  %v2830_v26 = vmax.f32 %v2798_v56, 0.0  ;;  %v2733_v49 = vmul.f32 %v3393_v33, %v4831_v21  ;;  %v2608_v20 = vpop.f32.mrb[25].mxu1 }
 0x463   : > { %2859 = vst.msk [vmem:[%s4849_s16 + $0xa0] sm:$0xff] %vm460_vm2, %v2827_v22  ;;  %v2828_v24 = vmax.f32 %v2796_v31, 0.0  ;;  %v2731_v39 = vmul.f32 %v4831_v21, %v2608_v20  ;;  %v3394_v16 = vpop.f32.mrb[26].mxu1 }
 0x464   : > { %2862 = vst.msk [vmem:[%s4849_s16 + $0xb8] sm:$0xff] %vm460_vm2, %v2830_v26  ;;  %v2769_v41 = vadd.f32 %v4834_v29, %v2733_v49  ;;  %v2734_v55 = vmul.f32 %v3394_v16, %v4831_v21  ;;  %v2611_v7 = vpop.f32.mrb[27].mxu1 }
 0x465   : > { %2860 = vst.msk [vmem:[%s4849_s16 + $0xa8] sm:$0xff] %vm460_vm2, %v2828_v24  ;;  %v2767_v58 = vadd.f32 %v4834_v29, %v2731_v39  ;;  %v2732_v34 = vmul.f32 %v4831_v21, %v2611_v7 }
 0x466   : > { %v2801_v45 = vadd.f32 %v2769_v41, %v2697_v12  ;;  %v2770_v15 = vadd.f32 %v4834_v29, %v2734_v55 }
 0x467   : > { %v2799_v61 = vadd.f32 %v2767_v58, %v2695_v43  ;;  %v2768_v23 = vadd.f32 %v4834_v29, %v2732_v34 }
 0x468   : > { %v2833_v9 = vmax.f32 %v2801_v45, 0.0  ;;  %v2802_v19 = vadd.f32 %v2770_v15, %v2698_v13 }
 0x469   : > { %v2831_v11 = vmax.f32 %v2799_v61, 0.0  ;;  %v2800_v48 = vadd.f32 %v2768_v23, %v2696_v2  ;;  %v3397_v52 = vpop.f32.mrb[28].mxu1 }
 0x46a   : > { %2865 = vst.msk [vmem:[%s4849_s16 + $0xd0] sm:$0xff] %vm460_vm2, %v2833_v9  ;;  %v2834_v62 = vmax.f32 %v2802_v19, 0.0  ;;  %v2737_v51 = vmul.f32 %v3397_v52, %v4831_v21  ;;  %v2624_v44 = vpop.f32.mrb[29].mxu1 }
 0x46b   : > { %2863 = vst.msk [vmem:[%s4849_s16 + $0xc0] sm:$0xff] %vm460_vm2, %v2831_v11  ;;  %v2832_v10 = vmax.f32 %v2800_v48, 0.0  ;;  %v2735_v0 = vmul.f32 %v4831_v21, %v2624_v44  ;;  %v3398_v3 = vpop.f32.mrb[30].mxu1 }
 0x46c   : > { %2866 = vst.msk [vmem:[%s4849_s16 + $0xd8] sm:$0xff] %vm460_vm2, %v2834_v62  ;;  %v2773_v4 = vadd.f32 %v4834_v29, %v2737_v51  ;;  %v2738_v6 = vmul.f32 %v3398_v3, %v4831_v21  ;;  %v2627_v36 = vpop.f32.mrb[31].mxu1 }
 0x46d   : > { %2864 = vst.msk [vmem:[%s4849_s16 + $0xc8] sm:$0xff] %vm460_vm2, %v2832_v10  ;;  %v2771_v60 = vadd.f32 %v4834_v29, %v2735_v0  ;;  %v2736_v63 = vmul.f32 %v4831_v21, %v2627_v36 }
 0x46e   : > { %v2805_v27 = vadd.f32 %v2773_v4, %v2701_v18  ;;  %v2774_v47 = vadd.f32 %v4834_v29, %v2738_v6 }
 0x46f   : > { %v2803_v53 = vadd.f32 %v2771_v60, %v2699_v14  ;;  %v2772_v37 = vadd.f32 %v4834_v29, %v2736_v63 }
 0x470   : > { %v2837_v32 = vmax.f32 %v2805_v27, 0.0  ;;  %v2806_v42 = vadd.f32 %v2774_v47, %v2702_v57 }
 0x471   : > { %v2835_v17 = vmax.f32 %v2803_v53, 0.0  ;;  %v2804_v50 = vadd.f32 %v2772_v37, %v2700_v35 }
 0x472   : > { %2869 = vst.msk [vmem:[%s4849_s16 + $0xf0] sm:$0xff] %vm460_vm2, %v2837_v32  ;;  %v2838_v46 = vmax.f32 %v2806_v42, 0.0 }
 0x473   : > { %2867 = vst.msk [vmem:[%s4849_s16 + $0xe0] sm:$0xff] %vm460_vm2, %v2835_v17  ;;  %v2836_v40 = vmax.f32 %v2804_v50, 0.0 }
 0x474   : > { %2870 = vst.msk [vmem:[%s4849_s16 + $0xf8] sm:$0xff] %vm460_vm2, %v2838_v46 }
 0x475   : > { %2868 = vst.msk [vmem:[%s4849_s16 + $0xe8] sm:$0xff] %vm460_vm2, %v2836_v40 }
 0x476 PF: > { %s14_s15 = sadd.s32 1, %s3612_s15  }
 0x477   : > { %p11_p4 = scmp.ge.s32.totalorder %s14_s15, 4  }
 0x479   :  { %13 = sbr.rel (!%p11_p4) target bundleno = 1 (0x1), region = 71 }

</bundles_post_ra>
